<compile_context>
chip_gen: v5e
topology: v5e:2x2
jax: 0.10.0
libtpu: 0.0.40
codegen_flags: <defaults>
</compile_context>

<pallas_src>
import functools

import jax
import jax.numpy as jnp
import numpy as np
from jax.experimental import pallas as pl
from jax.experimental.pallas import tpu as pltpu


def _round_up(x, m):
    return ((x + m - 1) // m) * m


def critic_kernel(sa_ref, ts_ref,
                  w1sa_ref, b1sa_ref,
                  emb_ref, w2_ref, b2_ref, w3_ref, b3_ref,
                  out_ref):
    # Fused fc1 (block-diagonal weight): [state|action] @ W -> (TILE_B, 512).
    # Columns 0:256 == relu(fc1_state), 256:512 == relu(fc1_action).
    x12 = jnp.dot(sa_ref[...], w1sa_ref[...],
                  preferred_element_type=jnp.float32) + b1sa_ref[...]
    x12 = jnp.maximum(x12, 0.0).astype(jnp.bfloat16)

    # Embedding lookup expressed as one-hot @ table (runs on the MXU).
    # Table rows are padded to a multiple of 128; padded rows are never hit.
    tb = ts_ref.shape[0]
    n_steps = emb_ref.shape[0]
    iota = jax.lax.broadcasted_iota(jnp.int32, (tb, n_steps), 1)
    onehot = (iota == ts_ref[...]).astype(jnp.bfloat16)          # (TILE_B, n_steps)
    # f32 accumulate then cast back: selecting a single bf16 row is lossless.
    x3 = jnp.dot(onehot, emb_ref[...],
                 preferred_element_type=jnp.float32).astype(jnp.bfloat16)

    # fc2 over concat([x1, x2, x3]) as two split-weight dots (K=512 and K=256);
    # static 128-aligned row slices of w2 are free.
    h = (jnp.dot(x12, w2_ref[0:512, :], preferred_element_type=jnp.float32)
         + jnp.dot(x3, w2_ref[512:768, :], preferred_element_type=jnp.float32)
         + b2_ref[...])
    h = jnp.maximum(h, 0.0)                                       # f32 (TILE_B, 128)

    # fc3 (128 -> 1), produced lane-dense: XLU transpose h, VPU multiply by the
    # fc3 weight column, sublane-reduce -> (1, TILE_B) unmasked row store.
    hT = h.T                                                      # (128, TILE_B)
    y = jnp.sum(hT * w3_ref[...], axis=0, keepdims=True) + b3_ref[0, 0]
    out_ref[...] = y.reshape(out_ref.shape)                       # (1, 1, TILE_B)


@functools.partial(jax.jit, static_argnames=("tile_b",))
def critic_forward(state, action, timestep, params, *, tile_b=None):
    """state: (B, S) f32, action: (B, A) f32, timestep: (B, 1) int32 -> (B, 1) f32."""
    w1sa, b1sa, emb, w2, b2, w3, b3 = params
    B = state.shape[0]

    if tile_b is None:
        # Single grid step for small batches (best on single-TC v5e/v6e).
        # On v7x pass tile_b explicitly so the number of tiles is even
        # (e.g. tile_b=128 for B<=256) and both TensorCores get work.
        tile_b = min(_round_up(B, 128), 512)
    Bp = _round_up(B, tile_b)
    num_tiles = Bp // tile_b

    if Bp != B:
        pad = Bp - B
        state = jnp.pad(state, ((0, pad), (0, 0)))
        action = jnp.pad(action, ((0, pad), (0, 0)))
        timestep = jnp.pad(timestep, ((0, pad), (0, 0)))  # pads with index 0 (valid)

    # Wrapper-side concat of state|action feeds the fused block-diagonal fc1.
    sa = jnp.concatenate([state, action], axis=1).astype(jnp.bfloat16)
    ts = timestep.astype(jnp.int32)

    SA = sa.shape[1]
    n_steps = emb.shape[0]

    batch_map = lambda i: (i, 0)   # activations: tile along batch
    const_map = lambda i: (0, 0)   # weights: resident across grid iterations

    flops = 2 * Bp * (SA * 512 + n_steps * 256 + 512 * 128 + 256 * 128 + 128)
    bytes_acc = (sa.size * 2 + ts.size * 4 + Bp * 4
                 + w1sa.size * 2 + b1sa.size * 4 + emb.size * 2
                 + w2.size * 2 + b2.size * 4 + w3.size * 4 + 4)
    ce = pl.CostEstimate(flops=int(flops), transcendentals=0,
                         bytes_accessed=int(bytes_acc))

    out = pl.pallas_call(
        critic_kernel,
        out_shape=jax.ShapeDtypeStruct((num_tiles, 1, tile_b), jnp.float32),
        grid_spec=pltpu.PrefetchScalarGridSpec(
            num_scalar_prefetch=0,
            grid=(num_tiles,),
            in_specs=[
                pl.BlockSpec((tile_b, SA), batch_map),       # [state|action]
                pl.BlockSpec((tile_b, 1), batch_map),        # timestep
                pl.BlockSpec((SA, 512), const_map),          # fused fc1 weight
                pl.BlockSpec((1, 512), const_map),           # fused fc1 bias
                pl.BlockSpec((n_steps, 256), const_map),     # emb (padded rows)
                pl.BlockSpec((768, 128), const_map),         # w2
                pl.BlockSpec((1, 128), const_map),           # b2
                pl.BlockSpec((128, 1), const_map),           # w3 (column vector)
                pl.BlockSpec(memory_space=pltpu.MemorySpace.SMEM),  # b3 scalar
            ],
            out_specs=pl.BlockSpec((1, 1, tile_b), lambda i: (i, 0, 0)),
        ),
        compiler_params=pltpu.CompilerParams(
            dimension_semantics=("parallel",)),
        cost_estimate=ce,
    )(sa, ts, w1sa, b1sa, emb, w2, b2, w3, b3)

    # Lane-dense (num_tiles, 1, tile_b) -> (B, 1).
    return out.reshape(Bp, 1)[:B]


def xavier_uniform(key, fan_in, fan_out):
    limit = float(np.sqrt(6.0 / (fan_in + fan_out)))
    # stored as (in, out) so the kernel computes x @ W (== PyTorch x @ W.T)
    return jax.random.uniform(key, (fan_in, fan_out), jnp.float32, -limit, limit)


def make_params(key, state_dim, action_dim, max_steps):
    ks = jax.random.split(key, 9)
    S, A = state_dim, action_dim

    w1s = xavier_uniform(ks[0], S, 256)
    b1s = jax.random.uniform(ks[1], (1, 256), jnp.float32, -1.0, 1.0) / np.sqrt(S)
    w1a = xavier_uniform(ks[2], A, 256)
    b1a = jax.random.uniform(ks[3], (1, 256), jnp.float32, -1.0, 1.0) / np.sqrt(A)

    # Block-diagonal fused fc1 weight: state rows feed cols 0:256, action rows
    # feed cols 256:512 (zeros elsewhere).  Mathematically identical to the two
    # separate Linear layers.
    w1sa = jnp.zeros((S + A, 512), jnp.float32)
    w1sa = w1sa.at[:S, :256].set(w1s).at[S:, 256:].set(w1a)
    w1sa = w1sa.astype(jnp.bfloat16)
    b1sa = jnp.concatenate([b1s, b1a], axis=1)                    # (1, 512) f32

    # Embedding table; pad rows to a multiple of 128 for MXU/lane alignment.
    emb = jax.random.normal(ks[4], (max_steps, 256), jnp.float32)
    steps_pad = _round_up(max_steps, 128)
    emb = jnp.pad(emb, ((0, steps_pad - max_steps), (0, 0))).astype(jnp.bfloat16)

    w2 = xavier_uniform(ks[5], 768, 128).astype(jnp.bfloat16)
    b2 = jax.random.uniform(ks[6], (1, 128), jnp.float32, -1.0, 1.0) / np.sqrt(768.0)
    # fc3 weight kept as an f32 column vector (used on the VPU, not the MXU).
    w3 = xavier_uniform(ks[7], 128, 1)                            # (128, 1) f32
    b3 = jax.random.uniform(ks[8], (1, 1), jnp.float32, -1.0, 1.0) / np.sqrt(128.0)
    return (w1sa, b1sa, emb, w2, b2, w3, b3)


def reference_forward(state, action, timestep, params):
    """Pure-JAX reference with the same mixed-precision pipeline as the kernel."""
    w1sa, b1sa, emb, w2, b2, w3, b3 = params
    sa = jnp.concatenate([state, action], axis=1).astype(jnp.bfloat16)
    x12 = jax.nn.relu(jnp.dot(sa, w1sa, preferred_element_type=jnp.float32) + b1sa)
    x3 = emb[timestep[:, 0]]                       # (B, 256) bf16 row gather
    x = jnp.concatenate([x12.astype(jnp.bfloat16), x3], axis=1)   # (B, 768)
    h = jax.nn.relu(jnp.dot(x, w2, preferred_element_type=jnp.float32) + b2)
    return jnp.dot(h, w3) + b3[0, 0]


if __name__ == "__main__":
    B = 200            # not a multiple of 128 -> exercises batch padding
    STATE_DIM = 32
    ACTION_DIM = 16
    MAX_STEPS = 100

    key = jax.random.PRNGKey(0)
    k_s, k_a, k_t, k_p = jax.random.split(key, 4)

    state = jax.random.normal(k_s, (B, STATE_DIM), jnp.float32)
    action = jax.random.normal(k_a, (B, ACTION_DIM), jnp.float32)
    timestep = jax.random.randint(k_t, (B, 1), 0, MAX_STEPS, jnp.int32)
    params = make_params(k_p, STATE_DIM, ACTION_DIM, MAX_STEPS)

    ref = reference_forward(state, action, timestep, params)

    # Default config: single grid step (v5e/v6e-optimal).
    out = critic_forward(state, action, timestep, params)
    out = jax.block_until_ready(out)
    assert out.shape == (B, 1)
    np.testing.assert_allclose(np.asarray(out), np.asarray(ref), rtol=1e-3, atol=1e-3)

    # v7x-style config: two parallel batch tiles (one per TensorCore).
    out2 = critic_forward(state, action, timestep, params, tile_b=128)
    out2 = jax.block_until_ready(out2)
    np.testing.assert_allclose(np.asarray(out2), np.asarray(ref), rtol=1e-3, atol=1e-3)

    print("KERNEL_OK")
</pallas_src>

<mosaic_0001>
module attributes {stable_mosaic.version = 11 : i64} {
  func.func @critic_kernel(%arg0: i32, %arg1: memref<256x48xbf16, #tpu.memory_space<vmem>>, %arg2: memref<256x1xi32, #tpu.memory_space<vmem>>, %arg3: memref<48x512xbf16, #tpu.memory_space<vmem>>, %arg4: memref<1x512xf32, #tpu.memory_space<vmem>>, %arg5: memref<128x256xbf16, #tpu.memory_space<vmem>>, %arg6: memref<768x128xbf16, #tpu.memory_space<vmem>>, %arg7: memref<1x128xf32, #tpu.memory_space<vmem>>, %arg8: memref<128x1xf32, #tpu.memory_space<vmem>>, %arg9: memref<1x1xf32, #tpu.memory_space<smem>>, %arg10: memref<1x1x256xf32, #tpu.memory_space<vmem>>) attributes {dimension_semantics = [#tpu.dimension_semantics<parallel>], iteration_bounds = array<i64: 1>, scalar_prefetch = 0 : i64, scratch_operands = 0 : i64, tpu.core_type = #tpu.core_type<tc>, window_params = [{transform_indices = @transform_0, window_bounds = array<i64: 256, 48>}, {transform_indices = @transform_1, window_bounds = array<i64: 256, 1>}, {pipeline_mode = #tpu.pipeline_mode<synchronous>, transform_indices = @transform_2, window_bounds = array<i64: 48, 512>}, {pipeline_mode = #tpu.pipeline_mode<synchronous>, transform_indices = @transform_3, window_bounds = array<i64: 1, 512>}, {pipeline_mode = #tpu.pipeline_mode<synchronous>, transform_indices = @transform_4, window_bounds = array<i64: 128, 256>}, {pipeline_mode = #tpu.pipeline_mode<synchronous>, transform_indices = @transform_5, window_bounds = array<i64: 768, 128>}, {pipeline_mode = #tpu.pipeline_mode<synchronous>, transform_indices = @transform_6, window_bounds = array<i64: 1, 128>}, {pipeline_mode = #tpu.pipeline_mode<synchronous>, transform_indices = @transform_7, window_bounds = array<i64: 128, 1>}, {transform_indices = @transform_8, window_bounds = array<i64: 1, 1>}, {transform_indices = @transform_9, window_bounds = array<i64: 1, 1, 256>}]} {
    %c0 = arith.constant 0 : index
    %c0_0 = arith.constant 0 : index
    %0 = vector.load %arg1[%c0, %c0_0] : memref<256x48xbf16, #tpu.memory_space<vmem>>, vector<256x48xbf16>
    %c0_1 = arith.constant 0 : index
    %c0_2 = arith.constant 0 : index
    %1 = vector.load %arg3[%c0_1, %c0_2] : memref<48x512xbf16, #tpu.memory_space<vmem>>, vector<48x512xbf16>
    %cst = arith.constant dense<0.000000e+00> : vector<256x512xf32>
    %2 = tpu.matmul %0, %1, %cst {dimension_numbers = #tpu.dot_dimension_numbers<[1], [0], [0], [1], [0, 0, 1, 1], [], []>} : vector<256x48xbf16>, vector<48x512xbf16>, vector<256x512xf32> -> vector<256x512xf32>
    %c0_3 = arith.constant 0 : index
    %c0_4 = arith.constant 0 : index
    %3 = vector.load %arg4[%c0_3, %c0_4] : memref<1x512xf32, #tpu.memory_space<vmem>>, vector<1x512xf32>
    %4 = vector.broadcast %3 : vector<1x512xf32> to vector<256x512xf32>
    %5 = arith.addf %2, %4 : vector<256x512xf32>
    %cst_5 = arith.constant 0.000000e+00 : f32
    %6 = vector.broadcast %cst_5 : f32 to vector<256x512xf32>
    %7 = arith.maximumf %5, %6 : vector<256x512xf32>
    %8 = arith.truncf %7 : vector<256x512xf32> to vector<256x512xbf16>
    %9 = tpu.iota {dimensions = array<i32: 1>} : vector<256x128xi32>
    %c0_6 = arith.constant 0 : index
    %c0_7 = arith.constant 0 : index
    %10 = vector.load %arg2[%c0_6, %c0_7] : memref<256x1xi32, #tpu.memory_space<vmem>>, vector<256x1xi32>
    %11 = vector.broadcast %10 : vector<256x1xi32> to vector<256x128xi32>
    %12 = arith.cmpi eq, %9, %11 : vector<256x128xi32>
    %13 = arith.extui %12 : vector<256x128xi1> to vector<256x128xi32>
    %14 = arith.sitofp %13 : vector<256x128xi32> to vector<256x128xf32>
    %15 = arith.truncf %14 : vector<256x128xf32> to vector<256x128xbf16>
    %c0_8 = arith.constant 0 : index
    %c0_9 = arith.constant 0 : index
    %16 = vector.load %arg5[%c0_8, %c0_9] : memref<128x256xbf16, #tpu.memory_space<vmem>>, vector<128x256xbf16>
    %cst_10 = arith.constant dense<0.000000e+00> : vector<256x256xf32>
    %17 = tpu.matmul %15, %16, %cst_10 {dimension_numbers = #tpu.dot_dimension_numbers<[1], [0], [0], [1], [0, 0, 1, 1], [], []>} : vector<256x128xbf16>, vector<128x256xbf16>, vector<256x256xf32> -> vector<256x256xf32>
    %18 = arith.truncf %17 : vector<256x256xf32> to vector<256x256xbf16>
    %c0_11 = arith.constant 0 : index
    %c0_12 = arith.constant 0 : index
    %19 = vector.load %arg6[%c0_11, %c0_12] : memref<768x128xbf16, #tpu.memory_space<vmem>>, vector<512x128xbf16>
    %cst_13 = arith.constant dense<0.000000e+00> : vector<256x128xf32>
    %20 = tpu.matmul %8, %19, %cst_13 {dimension_numbers = #tpu.dot_dimension_numbers<[1], [0], [0], [1], [0, 0, 1, 1], [], []>} : vector<256x512xbf16>, vector<512x128xbf16>, vector<256x128xf32> -> vector<256x128xf32>
    %c512 = arith.constant 512 : index
    %c0_14 = arith.constant 0 : index
    %21 = vector.load %arg6[%c512, %c0_14] : memref<768x128xbf16, #tpu.memory_space<vmem>>, vector<256x128xbf16>
    %cst_15 = arith.constant dense<0.000000e+00> : vector<256x128xf32>
    %22 = tpu.matmul %18, %21, %cst_15 {dimension_numbers = #tpu.dot_dimension_numbers<[1], [0], [0], [1], [0, 0, 1, 1], [], []>} : vector<256x256xbf16>, vector<256x128xbf16>, vector<256x128xf32> -> vector<256x128xf32>
    %23 = arith.addf %20, %22 : vector<256x128xf32>
    %c0_16 = arith.constant 0 : index
    %c0_17 = arith.constant 0 : index
    %24 = vector.load %arg7[%c0_16, %c0_17] : memref<1x128xf32, #tpu.memory_space<vmem>>, vector<1x128xf32>
    %25 = vector.broadcast %24 : vector<1x128xf32> to vector<256x128xf32>
    %26 = arith.addf %23, %25 : vector<256x128xf32>
    %cst_18 = arith.constant 0.000000e+00 : f32
    %27 = vector.broadcast %cst_18 : f32 to vector<256x128xf32>
    %28 = arith.maximumf %26, %27 : vector<256x128xf32>
    %29 = tpu.transpose %28, [1, 0] : vector<256x128xf32> -> vector<128x256xf32>
    %c0_19 = arith.constant 0 : index
    %c0_20 = arith.constant 0 : index
    %30 = vector.load %arg8[%c0_19, %c0_20] : memref<128x1xf32, #tpu.memory_space<vmem>>, vector<128x1xf32>
    %31 = vector.broadcast %30 : vector<128x1xf32> to vector<128x256xf32>
    %32 = arith.mulf %29, %31 : vector<128x256xf32>
    %cst_21 = arith.constant dense<0.000000e+00> : vector<256xf32>
    %33 = vector.multi_reduction <add>, %32, %cst_21 [0] : vector<128x256xf32> to vector<256xf32>
    %34 = vector.shape_cast %33 : vector<256xf32> to vector<1x256xf32>
    %c0_22 = arith.constant 0 : index
    %c0_23 = arith.constant 0 : index
    %35 = memref.load %arg9[%c0_22, %c0_23] : memref<1x1xf32, #tpu.memory_space<smem>>
    %36 = vector.broadcast %35 : f32 to vector<1x256xf32>
    %37 = arith.addf %34, %36 : vector<1x256xf32>
    %38 = vector.shape_cast %37 : vector<1x256xf32> to vector<1x1x256xf32>
    %c0_24 = arith.constant 0 : index
    %c0_25 = arith.constant 0 : index
    %c0_26 = arith.constant 0 : index
    %39 = vector.load %arg10[%c0_24, %c0_25, %c0_26] : memref<1x1x256xf32, #tpu.memory_space<vmem>>, vector<1x1x256xf32>
    tpu.vector_store %arg10[%c0_24, %c0_25, %c0_26], %38 {strides = array<i32>} : memref<1x1x256xf32, #tpu.memory_space<vmem>>, vector<1x1x256xf32>,
    return
  }
  func.func @transform_0(%arg0: i32) -> (i32, i32) {
    %c0_i32 = arith.constant 0 : i32
    %c0_i32_0 = arith.constant 0 : i32
    return %arg0, %c0_i32 : i32, i32
  }
  func.func @transform_1(%arg0: i32) -> (i32, i32) {
    %c0_i32 = arith.constant 0 : i32
    %c0_i32_0 = arith.constant 0 : i32
    return %arg0, %c0_i32 : i32, i32
  }
  func.func @transform_2(%arg0: i32) -> (i32, i32) {
    %c0_i32 = arith.constant 0 : i32
    %c0_i32_0 = arith.constant 0 : i32
    %c0_i32_1 = arith.constant 0 : i32
    return %c0_i32, %c0_i32_0 : i32, i32
  }
  func.func @transform_3(%arg0: i32) -> (i32, i32) {
    %c0_i32 = arith.constant 0 : i32
    %c0_i32_0 = arith.constant 0 : i32
    %c0_i32_1 = arith.constant 0 : i32
    return %c0_i32, %c0_i32_0 : i32, i32
  }
  func.func @transform_4(%arg0: i32) -> (i32, i32) {
    %c0_i32 = arith.constant 0 : i32
    %c0_i32_0 = arith.constant 0 : i32
    %c0_i32_1 = arith.constant 0 : i32
    return %c0_i32, %c0_i32_0 : i32, i32
  }
  func.func @transform_5(%arg0: i32) -> (i32, i32) {
    %c0_i32 = arith.constant 0 : i32
    %c0_i32_0 = arith.constant 0 : i32
    %c0_i32_1 = arith.constant 0 : i32
    return %c0_i32, %c0_i32_0 : i32, i32
  }
  func.func @transform_6(%arg0: i32) -> (i32, i32) {
    %c0_i32 = arith.constant 0 : i32
    %c0_i32_0 = arith.constant 0 : i32
    %c0_i32_1 = arith.constant 0 : i32
    return %c0_i32, %c0_i32_0 : i32, i32
  }
  func.func @transform_7(%arg0: i32) -> (i32, i32) {
    %c0_i32 = arith.constant 0 : i32
    %c0_i32_0 = arith.constant 0 : i32
    %c0_i32_1 = arith.constant 0 : i32
    return %c0_i32, %c0_i32_0 : i32, i32
  }
  func.func @transform_8(%arg0: i32) -> (i32, i32) {
    %c0_i32 = arith.constant 0 : i32
    %c0_i32_0 = arith.constant 0 : i32
    %c0_i32_1 = arith.constant 0 : i32
    return %c0_i32, %c0_i32_0 : i32, i32
  }
  func.func @transform_9(%arg0: i32) -> (i32, i32, i32) {
    %c0_i32 = arith.constant 0 : i32
    %c0_i32_0 = arith.constant 0 : i32
    %c0_i32_1 = arith.constant 0 : i32
    return %arg0, %c0_i32, %c0_i32_0 : i32, i32, i32
  }
}

</mosaic_0001>

<bundles_post_ra>
// kernel: critic_forward.1
= control target key start
LH: loop header
LB: loop body
LE: loop exit
PB: predicated region body
PF: predicated region fallthrough
CT: control target
= control target key end

     0   :  { %v3238_v0 = vmov 0   ;;  %vm228_vm0 = vcmask 392192   ;;  %s4665_s1 = inlined_call_operand.vmem [shape: s32[256,1], index: 1, kind: input, shape index: {}]   ;;  %s4666_s2 = inlined_call_operand.vmem [shape: bf16[48,512], index: 2, kind: input, shape index: {}]   ;;  %s4667_s4 = inlined_call_operand.vmem [shape: bf16[128,256], index: 4, kind: input, shape index: {}]   ;;  %s4668_s0 = inlined_call_operand.vmem [shape: bf16[256,48], index: 0, kind: input, shape index: {}]   ;;  %s4669_s7 = inlined_call_operand.vmem [shape: f32[128,1], index: 7, kind: input, shape index: {}]   ;;  %s4670_s5 = inlined_call_operand.vmem [shape: bf16[768,128], index: 5, kind: input, shape index: {}]   ;;  %s4671_s3 = inlined_call_operand.vmem [shape: f32[1,512], index: 3, kind: input, shape index: {}]   ;;  %s4672_s6 = inlined_call_operand.vmem [shape: f32[1,128], index: 6, kind: input, shape index: {}]   ;;  %s4673_s8 = inlined_call_operand.<no memory space> [shape: f32[1,1], index: 8, kind: input, shape index: {}]   ;;  %s4674_s9 = inlined_call_operand.vmem [shape: f32[1,1,256], index: 9, kind: output, shape index: {}]  }
   0x1   :  { %3235 = vset.pattern.permute.xlu1 %v3238_v0  ;;  %v829_v1 = vld [vmem:[%s4665_s1 + $0x10] sm:$0xff]  ;;  %v2710_v2 = vld [vmem:[%s4666_s2 + $0x40] sm:$0xf]  ;;  %3234 = vset.pattern.permute.xlu0 %v3238_v0  ;;  %v3164_v5 = vld [vmem:[%s4666_s2 + $0x44] sm:$0xf] }
   0x2   :  { %v3166_v3 = vld [vmem:[%s4666_s2 + $0x4c] sm:$0xf0]  ;;  %866 = vperm.xlu1 %3235, %v829_v1   ;;  %v2712_v6 = vld [vmem:[%s4666_s2 + $0x50] sm:$0xf0]  ;;  %v2694_v7 = vld [vmem:[%s4666_s2 + $0x20] sm:$0xf]  ;;  %3236 = vset.pattern.permute.xlu2 %v3238_v0 }
   0x3   :  { %v2711_v4 = vor.u32 %v3166_v3, %v2710_v2  ;;  %v2715_v8 = vor.u32 %v3164_v5, %v2712_v6  ;;  %v3162_v9 = vld [vmem:[%s4666_s2 + $0x2c] sm:$0xf0]  ;;  %v3160_v10 = vld [vmem:[%s4666_s2 + $0x24] sm:$0xf]  ;;  %v2696_v11 = vld [vmem:[%s4666_s2 + $0x30] sm:$0xf0] }
   0x4   :  { %v2695_v12 = vor.u32 %v3162_v9, %v2694_v7  ;;  %v2699_v13 = vor.u32 %v3160_v10, %v2696_v11  ;;  %v2678_v14 = vld [vmem:[%s4666_s2] sm:$0xf]  ;;  %v3158_v15 = vld [vmem:[%s4666_s2 + $0xc] sm:$0xf0]  ;;  %v3156_v16 = vld [vmem:[%s4666_s2 + $0x4] sm:$0xf] }
   0x5   :  { %282 = vmatpush.bf16.msra.mxu0 %v2711_v4  ;;  %371 = vmatpush.bf16.msra.mxu1 %v2715_v8  ;;  %v2680_v17 = vld [vmem:[%s4666_s2 + $0x10] sm:$0xf0]  ;;  %v2878_v18 = vld [vmem:[%s4667_s4 + $0x70] sm:$0xf]  ;;  %v3183_v19 = vld [vmem:[%s4667_s4 + $0x74] sm:$0xf0]  ;;  %v2679_v23 = vor.u32 %v3158_v15, %v2678_v14 }
   0x6   :  { %v830_v20 = vld [vmem:[%s4665_s1 + $0x18] sm:$0xff]  ;;  %v3182_v21 = vld [vmem:[%s4667_s4 + $0x74] sm:$0xf]  ;;  %v2683_v24 = vor.u32 %v3156_v16, %v2680_v17  ;;  %v2879_v25 = vor.u32 %v3183_v19, %v2878_v18  ;;  %v3347_v27 = vld [vmem:[%s4668_s0] sm:$0xff] }
   0x7   :  { %v2880_v22 = vld [vmem:[%s4667_s4 + $0x78] sm:$0xf0]  ;;  %v2870_v29 = vld [vmem:[%s4667_s4 + $0x60] sm:$0xf]  ;;  %v3181_v30 = vld [vmem:[%s4667_s4 + $0x64] sm:$0xf0] }
   0x8   :  { %v2883_v26 = vor.u32 %v3182_v21, %v2880_v22  ;;  %v834_v28 = vld [vmem:[%s4665_s1 + $0x38] sm:$0xff]  ;;  %v3180_v31 = vld [vmem:[%s4667_s4 + $0x64] sm:$0xf]  ;;  %v2871_v32 = vor.u32 %v3181_v30, %v2870_v29  ;;  %v2872_v33 = vld [vmem:[%s4667_s4 + $0x68] sm:$0xf0] }
   0x9   :  { %283 = vmatpush.bf16.msra.mxu0 %v2695_v12  ;;  %372 = vmatpush.bf16.msra.mxu1 %v2699_v13  ;;  %v2875_v34 = vor.u32 %v3180_v31, %v2872_v33  ;;  %v837_v35 = vld [vmem:[%s4665_s1 + $0x50] sm:$0xff]  ;;  %v3374_v36 = vld [vmem:[%s4668_s0 + $0x8] sm:$0xff]  ;;  %v827_v38 = vld [vmem:[%s4665_s1] sm:$0xff] }
   0xa   :  { %869 = vperm.xlu1 %3235, %v830_v20   ;;  %v840_v37 = vld [vmem:[%s4665_s1 + $0x68] sm:$0xff]  ;;  %860 = vperm.xlu0 %3234, %v827_v38   ;;  %v843_v39 = vld [vmem:[%s4665_s1 + $0x80] sm:$0xff]  ;;  %v3395_v41 = vld [vmem:[%s4668_s0 + $0x10] sm:$0xff] }
   0xb   :  { %v828_v40 = vld [vmem:[%s4665_s1 + $0x8] sm:$0xff]  ;;  %v846_v42 = vld [vmem:[%s4665_s1 + $0x98] sm:$0xff]  ;;  %v2862_v43 = vld [vmem:[%s4667_s4 + $0x50] sm:$0xf] }
   0xc   :  { %v3179_v44 = vld [vmem:[%s4667_s4 + $0x54] sm:$0xf0]  ;;  %v3178_v45 = vld [vmem:[%s4667_s4 + $0x54] sm:$0xf]  ;;  %v2864_v47 = vld [vmem:[%s4667_s4 + $0x58] sm:$0xf0] }
   0xd   :  { %284 = vmatpush.bf16.msra.mxu0 %v2679_v23  ;;  %373 = vmatpush.bf16.msra.mxu1 %v2683_v24  ;;  %v2863_v46 = vor.u32 %v3179_v44, %v2862_v43  ;;  %v2867_v48 = vor.u32 %v3178_v45, %v2864_v47  ;;  %v833_v49 = vld [vmem:[%s4665_s1 + $0x30] sm:$0xff]  ;;  %v836_v51 = vld [vmem:[%s4665_s1 + $0x48] sm:$0xff]  ;;  %v3428_v52 = vld [vmem:[%s4668_s0 + $0x18] sm:$0xff] }
   0xe   :  { %v849_v50 = vld [vmem:[%s4665_s1 + $0xb0] sm:$0xff]  ;;  %v852_v53 = vld [vmem:[%s4665_s1 + $0xc8] sm:$0xff]  ;;  %v839_v54 = vld [vmem:[%s4665_s1 + $0x60] sm:$0xff] }
   0xf   :  { %v831_v55 = vld [vmem:[%s4665_s1 + $0x20] sm:$0xff]  ;;  %v842_v57 = vld [vmem:[%s4665_s1 + $0x78] sm:$0xff]  ;;  %v3177_v61 = vld [vmem:[%s4667_s4 + $0x44] sm:$0xf0] }
  0x10   :  { %2724 = vmatmul.msk.bf16.vlgmr.msra.gmra.mxu0 %vm228_vm0, %v3347_v27  ;;  %2740 = vmatmul.msk.bf16.vlgmr.msra.gmra.mxu1 %vm228_vm0, %v3347_v27  ;;  %v855_v56 = vld [vmem:[%s4665_s1 + $0xe0] sm:$0xff]  ;;  %v858_v59 = vld [vmem:[%s4665_s1 + $0xf8] sm:$0xff]  ;;  %v2856_v0 = vld [vmem:[%s4667_s4 + $0x48] sm:$0xf0] }
  0x11   :  { %1163 = vmatpush.bf16.msrb.mxu0 %v2879_v25  ;;  %1252 = vmatpush.bf16.msrb.mxu1 %v2883_v26  ;;  %v3452_v58 = vld [vmem:[%s4668_s0 + $0x20] sm:$0xff]  ;;  %v832_v1 = vld [vmem:[%s4665_s1 + $0x28] sm:$0xff]  ;;  %v845_v3 = vld [vmem:[%s4665_s1 + $0x90] sm:$0xff] }
  0x12   :  { %881 = vperm.xlu1 %3235, %v834_v28   ;;  %863 = vperm.xlu0 %3234, %v828_v40   ;;  %v2854_v60 = vld [vmem:[%s4667_s4 + $0x40] sm:$0xf]  ;;  %v3176_v62 = vld [vmem:[%s4667_s4 + $0x44] sm:$0xf]  ;;  %v848_v6 = vld [vmem:[%s4665_s1 + $0xa8] sm:$0xff] }
  0x13   :  { %872 = vperm.xlu2 %3236, %v831_v55   ;;  %v2855_v63 = vor.u32 %v3177_v61, %v2854_v60  ;;  %v2859_v2 = vor.u32 %v3176_v62, %v2856_v0  ;;  %v2423_v4 = vld [vmem:[%s4669_s7] sm:$0xff]  ;;  %v3491_v7 = vld [vmem:[%s4668_s0 + $0x28] sm:$0xff]  ;;  %v838_v9 = vld [vmem:[%s4665_s1 + $0x58] sm:$0xff] }
  0x14   :  { %v835_v5 = vld [vmem:[%s4665_s1 + $0x40] sm:$0xff]  ;;  %v2424_v8 = vld [vmem:[%s4669_s7 + $0x8] sm:$0xff]  ;;  %v3167_v12 = vld [vmem:[%s4666_s2 + $0x54] sm:$0xf0] }
  0x15   :  { %1164 = vmatpush.bf16.msrb.mxu0 %v2871_v32  ;;  %1253 = vmatpush.bf16.msrb.mxu1 %v2875_v34  ;;  %v851_v10 = vld [vmem:[%s4665_s1 + $0xc0] sm:$0xff]  ;;  %v2718_v11 = vld [vmem:[%s4666_s2 + $0x48] sm:$0xf]  ;;  %v3165_v14 = vld [vmem:[%s4666_s2 + $0x4c] sm:$0xf] }
  0x16   :  { %v2719_v13 = vor.u32 %v3167_v12, %v2718_v11  ;;  %v2720_v15 = vld [vmem:[%s4666_s2 + $0x58] sm:$0xf0]  ;;  %v2702_v17 = vld [vmem:[%s4666_s2 + $0x28] sm:$0xf]  ;;  %v3163_v18 = vld [vmem:[%s4666_s2 + $0x34] sm:$0xf0] }
  0x17   :  { %v2723_v16 = vor.u32 %v3165_v14, %v2720_v15  ;;  %v3161_v19 = vld [vmem:[%s4666_s2 + $0x2c] sm:$0xf]  ;;  %v2703_v20 = vor.u32 %v3163_v18, %v2702_v17  ;;  %v2704_v21 = vld [vmem:[%s4666_s2 + $0x38] sm:$0xf0]  ;;  %v2425_v22 = vld [vmem:[%s4669_s7 + $0x10] sm:$0xff] }
  0x18   :  { %460 = vmatpush.bf16.msra.mxu2 %v2719_v13  ;;  %v2707_v23 = vor.u32 %v3161_v19, %v2704_v21  ;;  %v841_v24 = vld [vmem:[%s4665_s1 + $0x70] sm:$0xff]  ;;  %v854_v25 = vld [vmem:[%s4665_s1 + $0xd8] sm:$0xff]  ;;  %v2686_v26 = vld [vmem:[%s4666_s2 + $0x8] sm:$0xf] }
  0x19   :  { %1165 = vmatpush.bf16.msrb.mxu0 %v2863_v46  ;;  %1254 = vmatpush.bf16.msrb.mxu1 %v2867_v48  ;;  %v3159_v28 = vld [vmem:[%s4666_s2 + $0x14] sm:$0xf0]  ;;  %v3548_v29 = vld [vmem:[%s4668_s0 + $0x30] sm:$0xff]  ;;  %v3157_v31 = vld [vmem:[%s4666_s2 + $0xc] sm:$0xf] }
  0x1a   :  { %890 = vperm.xlu1 %3235, %v837_v35   ;;  %878 = vperm.xlu0 %3234, %v833_v49   ;;  %v2687_v30 = vor.u32 %v3159_v28, %v2686_v26  ;;  %v2688_v32 = vld [vmem:[%s4666_s2 + $0x18] sm:$0xf0]  ;;  %v2846_v35 = vld [vmem:[%s4667_s4 + $0x30] sm:$0xf]  ;;  %v3174_v38 = vld [vmem:[%s4667_s4 + $0x34] sm:$0xf] }
  0x1b   :  { %875 = vperm.xlu2 %3236, %v832_v1   ;;  %549 = vmatpush.bf16.msra.mxu3 %v2723_v16  ;;  %v2691_v33 = vor.u32 %v3157_v31, %v2688_v32  ;;  %v2426_v34 = vld [vmem:[%s4669_s7 + $0x18] sm:$0xff]  ;;  %v857_v44 = vld [vmem:[%s4665_s1 + $0xf0] sm:$0xff]  ;;  %v2427_v45 = vld [vmem:[%s4669_s7 + $0x20] sm:$0xff] }
  0x1c   :  { %461 = vmatpush.bf16.msra.mxu2 %v2703_v20  ;;  %v2848_v40 = vld [vmem:[%s4667_s4 + $0x38] sm:$0xf0]  ;;  %v847_v47 = vld [vmem:[%s4665_s1 + $0xa0] sm:$0xff]  ;;  %v2428_v49 = vld [vmem:[%s4669_s7 + $0x28] sm:$0xff] }
  0x1d   :  { %1166 = vmatpush.bf16.msrb.mxu0 %v2855_v63  ;;  %1255 = vmatpush.bf16.msrb.mxu1 %v2859_v2  ;;  %v2851_v43 = vor.u32 %v3174_v38, %v2848_v40  ;;  %v3223_v46 = vld [vmem:[%s4670_s5 + $0x138] sm:$0xff]  ;;  %v2838_v61 = vld [vmem:[%s4667_s4 + $0x20] sm:$0xf]  ;;  %v3173_v62 = vld [vmem:[%s4667_s4 + $0x24] sm:$0xf0] }
  0x1e   :  { %v3600_v48 = vld [vmem:[%s4668_s0 + $0x38] sm:$0xff]  ;;  %v2839_v63 = vor.u32 %v3173_v62, %v2838_v61  ;;  %v3172_v0 = vld [vmem:[%s4667_s4 + $0x24] sm:$0xf]  ;;  %v2840_v1 = vld [vmem:[%s4667_s4 + $0x28] sm:$0xf0] }
  0x1f   :  { %550 = vmatpush.bf16.msra.mxu3 %v2707_v23  ;;  %v2843_v2 = vor.u32 %v3172_v0, %v2840_v1  ;;  %v2431_v12 = vld [vmem:[%s4669_s7 + $0x40] sm:$0xff]  ;;  %v3222_v14 = vld [vmem:[%s4670_s5 + $0x130] sm:$0xff]  ;;  %v856_v16 = vld [vmem:[%s4665_s1 + $0xe8] sm:$0xff] }
  0x20   :  { %2725 = vmatmul.msk.bf16.gmra.mxu0 %vm228_vm0, %v3374_v36  ;;  %2741 = vmatmul.msk.bf16.gmra.mxu1 %vm228_vm0, %v3374_v36  ;;  %v3230_v15 = vld [vmem:[%s4670_s5 + $0x170] sm:$0xff]  ;;  %v3684_v19 = vld [vmem:[%s4668_s0 + $0x48] sm:$0xff]  ;;  %v2435_v62 = vld [vmem:[%s4669_s7 + $0x60] sm:$0xff] }
  0x21   :  { %462 = vmatpush.bf16.msra.mxu2 %v2687_v30  ;;  %1256 = vmatpush.bf16.msrb.mxu1 %v2851_v43  ;;  %v3711_v38 = vld [vmem:[%s4668_s0 + $0x50] sm:$0xff]  ;;  %v3221_v0 = vld [vmem:[%s4670_s5 + $0x128] sm:$0xff] }
  0x22   :  { %899 = vperm.xlu1 %3235, %v840_v37   ;;  %887 = vperm.xlu0 %3234, %v836_v51   ;;  %v3175_v37 = vld [vmem:[%s4667_s4 + $0x34] sm:$0xf0]  ;;  %v2429_v51 = vld [vmem:[%s4669_s7 + $0x30] sm:$0xff]  ;;  %v3229_v1 = vld [vmem:[%s4670_s5 + $0x168] sm:$0xff] }
  0x23   :  { %884 = vperm.xlu2 %3236, %v835_v5   ;;  %551 = vmatpush.bf16.msra.mxu3 %v2691_v33  ;;  %v2433_v33 = vld [vmem:[%s4669_s7 + $0x50] sm:$0xff] }
  0x24   :  { %2756 = vmatmul.msk.bf16.vlgmr.msra.gmra.mxu2 %vm228_vm0, %v3347_v27  ;;  %v2830_v43 = vld [vmem:[%s4667_s4 + $0x10] sm:$0xf] }
  0x25   :  { %1565 = vmatpush.bf16.msrb.mxu2 %v3223_v46  ;;  %1257 = vmatpush.bf16.msrb.mxu1 %v2843_v2  ;;  %v3170_v46 = vld [vmem:[%s4667_s4 + $0x14] sm:$0xf] }
  0x26   :  { %2772 = vmatmul.msk.bf16.vlgmr.msra.gmra.mxu3 %vm228_vm0, %v3347_v27  ;;  %v3231_v27 = vld [vmem:[%s4670_s5 + $0x178] sm:$0xff] }
  0x27   :  { %1654 = vmatpush.bf16.msrb.mxu3 %v3231_v27  ;;  %v2832_v27 = vld [vmem:[%s4667_s4 + $0x18] sm:$0xf0] }
  0x29   :  { %1566 = vmatpush.bf16.msrb.mxu2 %v3222_v14 }
  0x2a   :  { %908 = vperm.xlu1 %3235, %v843_v39   ;;  %896 = vperm.xlu0 %3234, %v839_v54   ;;  %v2847_v39 = vor.u32 %v3175_v37, %v2846_v35  ;;  %v3625_v54 = vld [vmem:[%s4668_s0 + $0x40] sm:$0xff] }
  0x2b   :  { %893 = vperm.xlu2 %3236, %v838_v9   ;;  %1655 = vmatpush.bf16.msrb.mxu3 %v3230_v15 }
  0x2c   :  { %1167 = vmatpush.bf16.msrb.mxu0 %v2847_v39 }
  0x2d   :  { %1567 = vmatpush.bf16.msrb.mxu2 %v3221_v0 }
  0x2f   :  { %1656 = vmatpush.bf16.msrb.mxu3 %v3229_v1 }
  0x30   :  { %2726 = vmatmul.msk.bf16.gmra.mxu0 %vm228_vm0, %v3395_v41  ;;  %2742 = vmatmul.msk.bf16.gmra.mxu1 %vm228_vm0, %v3395_v41 }
  0x31   :  { %1168 = vmatpush.bf16.msrb.mxu0 %v2839_v63 }
  0x32   :  { %917 = vperm.xlu1 %3235, %v846_v42   ;;  %905 = vperm.xlu0 %3234, %v842_v57   ;;  %v844_v42 = vld [vmem:[%s4665_s1 + $0x88] sm:$0xff] }
  0x33   :  { %902 = vperm.xlu2 %3236, %v841_v24  }
  0x34   :  { %2757 = vmatmul.msk.bf16.gmra.mxu2 %vm228_vm0, %v3374_v36 }
  0x36   :  { %2773 = vmatmul.msk.bf16.gmra.mxu3 %vm228_vm0, %v3374_v36  ;;  %v3630_v36 = vld [vmem:[%s4671_s3] sm:$0xf] }
  0x37   :  { %v3633_v57 = vperm.slane %v3630_v36, 0  ;;  %v3641_v60 = vperm.slane %v3630_v36, 1 }
  0x3a   :  { %926 = vperm.xlu1 %3235, %v849_v50   ;;  %914 = vperm.xlu0 %3234, %v845_v3   ;;  %v850_v50 = vld [vmem:[%s4665_s1 + $0xb8] sm:$0xff] }
  0x3b   :  { %911 = vperm.xlu2 %3236, %v844_v42   ;;  %v2434_v42 = vld [vmem:[%s4669_s7 + $0x58] sm:$0xff] }
  0x40   :  { %2727 = vmatmul.msk.bf16.gmra.mxu0 %vm228_vm0, %v3428_v52  ;;  %2743 = vmatmul.msk.bf16.gmra.mxu1 %vm228_vm0, %v3428_v52 }
  0x42   :  { %935 = vperm.xlu1 %3235, %v852_v53   ;;  %923 = vperm.xlu0 %3234, %v848_v6   ;;  %v853_v53 = vld [vmem:[%s4665_s1 + $0xd0] sm:$0xff] }
  0x43   :  { %920 = vperm.xlu2 %3236, %v847_v47   ;;  %v2835_v47 = vor.u32 %v3170_v46, %v2832_v27 }
  0x44   :  { %2758 = vmatmul.msk.bf16.gmra.mxu2 %vm228_vm0, %v3395_v41 }
  0x45   :  { %1258 = vmatpush.bf16.msrb.mxu1 %v2835_v47 }
  0x46   :  { %2774 = vmatmul.msk.bf16.gmra.mxu3 %vm228_vm0, %v3395_v41 }
  0x4a   :  { %944 = vperm.xlu1 %3235, %v855_v56   ;;  %932 = vperm.xlu0 %3234, %v851_v10  }
  0x4b   :  { %929 = vperm.xlu2 %3236, %v850_v50  }
  0x50   :  { %2728 = vmatmul.msk.bf16.gmra.mxu0 %vm228_vm0, %v3452_v58  ;;  %2744 = vmatmul.msk.bf16.gmra.mxu1 %vm228_vm0, %v3452_v58 }
  0x52   :  { %953 = vperm.xlu1 %3235, %v858_v59   ;;  %941 = vperm.xlu0 %3234, %v854_v25   ;;  %v2430_v59 = vld [vmem:[%s4669_s7 + $0x38] sm:$0xff] }
  0x53   :  { %938 = vperm.xlu2 %3236, %v853_v53  }
  0x54   :  { %2759 = vmatmul.msk.bf16.gmra.mxu2 %vm228_vm0, %v3428_v52 }
  0x56   :  { %2775 = vmatmul.msk.bf16.gmra.mxu3 %vm228_vm0, %v3428_v52 }
  0x5a   :  { %2441 = vperm.xlu1 %3235, %v2423_v4   ;;  %950 = vperm.xlu0 %3234, %v857_v44   ;;  %v3171_v44 = vld [vmem:[%s4667_s4 + $0x14] sm:$0xf0] }
  0x5b   :  { %947 = vperm.xlu2 %3236, %v856_v16   ;;  %v2437_v16 = vld [vmem:[%s4669_s7 + $0x70] sm:$0xff] }
  0x60   :  { %2729 = vmatmul.msk.bf16.gmra.mxu0 %vm228_vm0, %v3491_v7  ;;  %2745 = vmatmul.msk.bf16.gmra.mxu1 %vm228_vm0, %v3491_v7 }
  0x62   :  { %2446 = vperm.xlu1 %3235, %v2424_v8  }
  0x64   :  { %2760 = vmatmul.msk.bf16.gmra.mxu2 %vm228_vm0, %v3452_v58 }
  0x66   :  { %2776 = vmatmul.msk.bf16.gmra.mxu3 %vm228_vm0, %v3452_v58 }
  0x6a   :  { %2451 = vperm.xlu1 %3235, %v2425_v22   ;;  %v2432_v22 = vld [vmem:[%s4669_s7 + $0x48] sm:$0xff] }
  0x70   :  { %2730 = vmatmul.msk.bf16.gmra.mxu0 %vm228_vm0, %v3548_v29  ;;  %2746 = vmatmul.msk.bf16.gmra.mxu1 %vm228_vm0, %v3548_v29 }
  0x72   :  { %2456 = vperm.xlu1 %3235, %v2426_v34  }
  0x74   :  { %2761 = vmatmul.msk.bf16.gmra.mxu2 %vm228_vm0, %v3491_v7 }
  0x76   :  { %2777 = vmatmul.msk.bf16.gmra.mxu3 %vm228_vm0, %v3491_v7 }
  0x7a   :  { %2461 = vperm.xlu1 %3235, %v2427_v45   ;;  %v2831_v45 = vor.u32 %v3171_v44, %v2830_v43 }
  0x7c   :  { %1169 = vmatpush.bf16.msrb.mxu0 %v2831_v45 }
  0x80   :  { %2731 = vmatmul.msk.bf16.gmra.mxu0 %vm228_vm0, %v3600_v48  ;;  %2747 = vmatmul.msk.bf16.gmra.mxu1 %vm228_vm0, %v3600_v48 }
  0x82   :  { %2466 = vperm.xlu1 %3235, %v2428_v49  }
  0x84   :  { %2762 = vmatmul.msk.bf16.gmra.mxu2 %vm228_vm0, %v3548_v29 }
  0x86   :  { %2778 = vmatmul.msk.bf16.gmra.mxu3 %vm228_vm0, %v3548_v29  ;;  %v3220_v29 = vld [vmem:[%s4670_s5 + $0x120] sm:$0xff] }
  0x87   :  { %1568 = vmatpush.bf16.msrb.mxu2 %v3220_v29 }
  0x8a   :  { %2471 = vperm.xlu1 %3235, %v2429_v51  }
  0x8d   :  { %v286_v55 = vpop.f32.mrf.mxu0  ;;  %v375_v56 = vpop.f32.mrf.mxu1 }
  0x8e   :  { %v287_v3 = vadd.f32 %v286_v55, %v3633_v57  ;;  %v376_v4 = vadd.f32 %v375_v56, %v3641_v60 }
  0x90   :  { %2732 = vmatmul.msk.bf16.gmra.mxu0 %vm228_vm0, %v3625_v54  ;;  %2748 = vmatmul.msk.bf16.gmra.mxu1 %vm228_vm0, %v3625_v54  ;;  %v633_v10 = vmax.f32 %v287_v3, 0.0  ;;  %v634_v41 = vmax.f32 %v376_v4, 0.0  ;;  %v3756_v4 = vld [vmem:[%s4668_s0 + $0x58] sm:$0xff] }
  0x92   :  { %2476 = vperm.xlu1 %3235, %v2430_v59  }
  0x94   :  { %2763 = vmatmul.msk.bf16.gmra.mxu2 %vm228_vm0, %v3600_v48 }
  0x95   :  { %v288_v5 = vpop.f32.mrf.mxu0  ;;  %v377_v8 = vpop.f32.mrf.mxu1 }
  0x96   :  { %v289_v6 = vadd.f32 %v288_v5, %v3633_v57  ;;  %v378_v9 = vadd.f32 %v377_v8, %v3641_v60  ;;  %v2436_v8 = vld [vmem:[%s4669_s7 + $0x68] sm:$0xff]  ;;  %2779 = vmatmul.msk.bf16.gmra.mxu3 %vm228_vm0, %v3600_v48  ;;  %v3846_v48 = vld [vmem:[%s4668_s0 + $0x70] sm:$0xff] }
  0x98   :  { %v637_v11 = vmax.f32 %v289_v6, 0.0  ;;  %v638_v13 = vmax.f32 %v378_v9, 0.0 }
  0x9a   :  { %v3677_v17 = vpack.c.bf16 %v637_v11, %v633_v10  ;;  %v3679_v18 = vpack.c.bf16 %v638_v13, %v634_v41  ;;  %2481 = vperm.xlu1 %3235, %v2431_v12  }
  0x9d   :  { %v291_v20 = vpop.f32.mrf.mxu0  ;;  %v380_v21 = vpop.f32.mrf.mxu1 }
  0x9e   :  { %v292_v23 = vadd.f32 %v291_v20, %v3633_v57  ;;  %v381_v24 = vadd.f32 %v380_v21, %v3641_v60 }
  0xa0   :  { %2733 = vmatmul.msk.bf16.gmra.mxu0 %vm228_vm0, %v3684_v19  ;;  %2749 = vmatmul.msk.bf16.gmra.mxu1 %vm228_vm0, %v3684_v19  ;;  %v641_v31 = vmax.f32 %v292_v23, 0.0  ;;  %v642_v34 = vmax.f32 %v381_v24, 0.0  ;;  %v3783_v23 = vld [vmem:[%s4668_s0 + $0x60] sm:$0xff] }
  0xa2   :  { %2486 = vperm.xlu1 %3235, %v2432_v22  }
  0xa4   :  { %2764 = vmatmul.msk.bf16.gmra.mxu2 %vm228_vm0, %v3625_v54 }
  0xa5   :  { %v293_v25 = vpop.f32.mrf.mxu0  ;;  %v382_v28 = vpop.f32.mrf.mxu1 }
  0xa6   :  { %v294_v26 = vadd.f32 %v293_v25, %v3633_v57  ;;  %v383_v30 = vadd.f32 %v382_v28, %v3641_v60  ;;  %v2822_v28 = vld [vmem:[%s4667_s4] sm:$0xf]  ;;  %2780 = vmatmul.msk.bf16.gmra.mxu3 %vm228_vm0, %v3625_v54 }
  0xa8   :  { %v645_v32 = vmax.f32 %v294_v26, 0.0  ;;  %v646_v35 = vmax.f32 %v383_v30, 0.0  ;;  %v2438_v26 = vld [vmem:[%s4669_s7 + $0x78] sm:$0xff]  ;;  %v3169_v30 = vld [vmem:[%s4667_s4 + $0x4] sm:$0xf0] }
  0xaa   :  { %v3704_v37 = vpack.c.bf16 %v645_v32, %v641_v31  ;;  %2491 = vperm.xlu1 %3235, %v2433_v33   ;;  %v3706_v52 = vpack.c.bf16 %v646_v35, %v642_v34  ;;  %v2823_v31 = vor.u32 %v3169_v30, %v2822_v28  ;;  %v3168_v32 = vld [vmem:[%s4667_s4 + $0x4] sm:$0xf]  ;;  %v2824_v33 = vld [vmem:[%s4667_s4 + $0x8] sm:$0xf0] }
  0xab   :  { %v2827_v34 = vor.u32 %v3168_v32, %v2824_v33  ;;  %v3865_v32 = vperm.slane %v3630_v36, 3  ;;  %v3219_v33 = vld [vmem:[%s4670_s5 + $0x118] sm:$0xff] }
  0xac   :  { %1170 = vmatpush.bf16.msrb.mxu0 %v2823_v31  ;;  %1569 = vmatpush.bf16.msrb.mxu2 %v3219_v33 }
  0xad   :  { %v296_v39 = vpop.f32.mrf.mxu0  ;;  %v385_v40 = vpop.f32.mrf.mxu1  ;;  %1259 = vmatpush.bf16.msrb.mxu1 %v2827_v34  ;;  %v3227_v34 = vld [vmem:[%s4670_s5 + $0x158] sm:$0xff] }
  0xae   :  { %v297_v49 = vadd.f32 %v296_v39, %v3633_v57  ;;  %v386_v50 = vadd.f32 %v385_v40, %v3641_v60 }
  0xb0   :  { %2734 = vmatmul.msk.bf16.gmra.mxu0 %vm228_vm0, %v3711_v38  ;;  %2750 = vmatmul.msk.bf16.gmra.mxu1 %vm228_vm0, %v3711_v38  ;;  %v649_v59 = vmax.f32 %v297_v49, 0.0  ;;  %v650_v58 = vmax.f32 %v386_v50, 0.0  ;;  %v3228_v49 = vld [vmem:[%s4670_s5 + $0x160] sm:$0xff] }
  0xb1   :  { %1657 = vmatpush.bf16.msrb.mxu3 %v3228_v49 }
  0xb2   :  { %2496 = vperm.xlu1 %3235, %v2434_v42  }
  0xb4   :  { %2765 = vmatmul.msk.bf16.gmra.mxu2 %vm228_vm0, %v3684_v19 }
  0xb5   :  { %v298_v51 = vpop.f32.mrf.mxu0  ;;  %v387_v55 = vpop.f32.mrf.mxu1  ;;  %1658 = vmatpush.bf16.msrb.mxu3 %v3227_v34 }
  0xb6   :  { %v299_v53 = vadd.f32 %v298_v51, %v3633_v57  ;;  %v388_v56 = vadd.f32 %v387_v55, %v3641_v60  ;;  %2781 = vmatmul.msk.bf16.gmra.mxu3 %vm228_vm0, %v3684_v19 }
  0xb8   :  { %v653_v61 = vmax.f32 %v299_v53, 0.0  ;;  %v654_v63 = vmax.f32 %v388_v56, 0.0  ;;  %v3825_v53 = vld [vmem:[%s4668_s0 + $0x68] sm:$0xff] }
  0xba   :  { %v3749_v2 = vpack.c.bf16 %v653_v61, %v649_v59  ;;  %2501 = vperm.xlu1 %3235, %v2435_v62   ;;  %v3751_v3 = vpack.c.bf16 %v654_v63, %v650_v58 }
  0xbd   :  { %v301_v5 = vpop.f32.mrf.mxu0  ;;  %v390_v6 = vpop.f32.mrf.mxu1 }
  0xbe   :  { %v302_v9 = vadd.f32 %v301_v5, %v3633_v57  ;;  %v391_v10 = vadd.f32 %v390_v6, %v3641_v60 }
  0xc0   :  { %2735 = vmatmul.msk.bf16.gmra.mxu0 %vm228_vm0, %v3756_v4  ;;  %2751 = vmatmul.msk.bf16.gmra.mxu1 %vm228_vm0, %v3756_v4  ;;  %v657_v14 = vmax.f32 %v302_v9, 0.0  ;;  %v658_v20 = vmax.f32 %v391_v10, 0.0 }
  0xc2   :  { %2506 = vperm.xlu1 %3235, %v2436_v8  }
  0xc4   :  { %2766 = vmatmul.msk.bf16.gmra.mxu2 %vm228_vm0, %v3711_v38 }
  0xc5   :  { %v303_v11 = vpop.f32.mrf.mxu0  ;;  %v392_v41 = vpop.f32.mrf.mxu1 }
  0xc6   :  { %v304_v12 = vadd.f32 %v303_v11, %v3633_v57  ;;  %v393_v13 = vadd.f32 %v392_v41, %v3641_v60  ;;  %2782 = vmatmul.msk.bf16.gmra.mxu3 %vm228_vm0, %v3711_v38 }
  0xc8   :  { %v661_v15 = vmax.f32 %v304_v12, 0.0  ;;  %v662_v21 = vmax.f32 %v393_v13, 0.0  ;;  %v464_v13 = vpop.f32.mrf.mxu2 }
  0xca   :  { %v3776_v22 = vpack.c.bf16 %v661_v15, %v657_v14  ;;  %2511 = vperm.xlu1 %3235, %v2437_v16   ;;  %v3778_v7 = vpack.c.bf16 %v662_v21, %v658_v20  ;;  %v3859_v16 = vperm.slane %v3630_v36, 2  ;;  %v3881_v36 = vld [vmem:[%s4668_s0 + $0x78] sm:$0xff] }
  0xcc   :  { %v465_v54 = vadd.f32 %v464_v13, %v3859_v16 }
  0xcd   :  { %v306_v24 = vpop.f32.mrf.mxu0  ;;  %v395_v25 = vpop.f32.mrf.mxu1 }
  0xce   :  { %v307_v35 = vadd.f32 %v306_v24, %v3633_v57  ;;  %v396_v39 = vadd.f32 %v395_v25, %v3641_v60  ;;  %v553_v24 = vpop.f32.mrf.mxu3 }
  0xd0   :  { %2736 = vmatmul.msk.bf16.gmra.mxu0 %vm228_vm0, %v3783_v23  ;;  %2752 = vmatmul.msk.bf16.gmra.mxu1 %vm228_vm0, %v3783_v23  ;;  %v665_v45 = vmax.f32 %v307_v35, 0.0  ;;  %v666_v27 = vmax.f32 %v396_v39, 0.0  ;;  %v554_v39 = vadd.f32 %v553_v24, %v3865_v32 }
  0xd2   :  { %2516 = vperm.xlu1 %3235, %v2438_v26  }
  0xd4   :  { %2767 = vmatmul.msk.bf16.gmra.mxu2 %vm228_vm0, %v3756_v4 }
  0xd5   :  { %v308_v40 = vpop.f32.mrf.mxu0  ;;  %v397_v43 = vpop.f32.mrf.mxu1 }
  0xd6   :  { %v309_v42 = vadd.f32 %v308_v40, %v3633_v57  ;;  %v398_v44 = vadd.f32 %v397_v43, %v3641_v60  ;;  %2783 = vmatmul.msk.bf16.gmra.mxu3 %vm228_vm0, %v3756_v4 }
  0xd8   :  { %v669_v46 = vmax.f32 %v309_v42, 0.0  ;;  %v670_v47 = vmax.f32 %v398_v44, 0.0  ;;  %v466_v42 = vpop.f32.mrf.mxu2  ;;  %v635_v44 = vmax.f32 %v465_v54, 0.0 }
  0xda   :  { %v3818_v50 = vpack.c.bf16 %v669_v46, %v665_v45  ;;  %v3820_v51 = vpack.c.bf16 %v670_v47, %v666_v27  ;;  %v467_v45 = vadd.f32 %v466_v42, %v3859_v16  ;;  %v555_v27 = vpop.f32.mrf.mxu3  ;;  %v636_v47 = vmax.f32 %v554_v39, 0.0 }
  0xdb   :  { %v556_v49 = vadd.f32 %v555_v27, %v3865_v32 }
  0xdc   :  { %v639_v29 = vmax.f32 %v467_v45, 0.0 }
  0xdd   :  { %v311_v55 = vpop.f32.mrf.mxu0  ;;  %v400_v56 = vpop.f32.mrf.mxu1 }
  0xde   :  { %v312_v59 = vadd.f32 %v311_v55, %v3633_v57  ;;  %v401_v61 = vadd.f32 %v400_v56, %v3641_v60  ;;  %v861_v55 = vpop.permute.xlu0 %860  ;;  %v3889_v56 = vpack.c.bf16 %v639_v29, %v635_v44  ;;  %v867_v44 = vpop.permute.xlu1 %866 }
  0xe0   :  { %2737 = vmatmul.msk.bf16.gmra.mxu0 %vm228_vm0, %v3825_v53  ;;  %2753 = vmatmul.msk.bf16.gmra.mxu1 %vm228_vm0, %v3825_v53  ;;  %v673_v1 = vmax.f32 %v312_v59, 0.0  ;;  %v674_v6 = vmax.f32 %v401_v61, 0.0  ;;  %v640_v59 = vmax.f32 %v556_v49, 0.0 }
  0xe2   :  { %v3893_v61 = vpack.c.bf16 %v640_v59, %v636_v47 }
  0xe4   :  { %2768 = vmatmul.msk.bf16.gmra.mxu2 %vm228_vm0, %v3783_v23 }
  0xe5   :  { %v313_v62 = vpop.f32.mrf.mxu0  ;;  %v402_v63 = vpop.f32.mrf.mxu1 }
  0xe6   :  { %v314_v58 = vadd.f32 %v313_v62, %v3633_v57  ;;  %v403_v0 = vadd.f32 %v402_v63, %v3641_v60  ;;  %v4675_v62 = vlaneseq  ;;  %v469_v63 = vpop.f32.mrf.mxu2  ;;  %2784 = vmatmul.msk.bf16.gmra.mxu3 %vm228_vm0, %v3783_v23 }
  0xe8   :  { %v677_v5 = vmax.f32 %v314_v58, 0.0  ;;  %v678_v8 = vmax.f32 %v403_v0, 0.0 }
  0xea   :  { %v3839_v9 = vpack.c.bf16 %v677_v5, %v673_v1  ;;  %v3841_v10 = vpack.c.bf16 %v678_v8, %v674_v6  ;;  %v558_v8 = vpop.f32.mrf.mxu3 }
  0xeb   :  { %v559_v24 = vadd.f32 %v558_v8, %v3865_v32 }
  0xed   :  { %v316_v11 = vpop.f32.mrf.mxu0  ;;  %v405_v12 = vpop.f32.mrf.mxu1  ;;  %v644_v34 = vmax.f32 %v559_v24, 0.0 }
  0xee   :  { %v317_v41 = vadd.f32 %v316_v11, %v3633_v57  ;;  %v406_v14 = vadd.f32 %v405_v12, %v3641_v60  ;;  %v3902_v12 = vand.u32 127, %v4675_v62 }
  0xf0   :  { %2738 = vmatmul.msk.bf16.gmra.mxu0 %vm228_vm0, %v3846_v48  ;;  %2754 = vmatmul.msk.bf16.gmra.mxu1 %vm228_vm0, %v3846_v48  ;;  %v681_v26 = vmax.f32 %v317_v41, 0.0  ;;  %v682_v30 = vmax.f32 %v406_v14, 0.0  ;;  %vm955_vm1 = vcmp.eq.s32.totalorder %v3902_v12, %v861_v55  ;;  %vm957_vm4 = vcmp.eq.s32.totalorder %v3902_v12, %v867_v44 }
  0xf2   :  { %v560_v33 = vpop.f32.mrf.mxu3 }
  0xf3   :  { %v561_v42 = vadd.f32 %v560_v33, %v3865_v32 }
  0xf5   :  { %v318_v15 = vpop.f32.mrf.mxu0  ;;  %v407_v21 = vpop.f32.mrf.mxu1  ;;  %v648_v45 = vmax.f32 %v561_v42, 0.0 }
  0xf6   :  { %v319_v20 = vadd.f32 %v318_v15, %v3633_v57  ;;  %v408_v25 = vadd.f32 %v407_v21, %v3641_v60  ;;  %v470_v15 = vadd.f32 %v469_v63, %v3859_v16  ;;  %v864_v21 = vpop.permute.xlu0 %863  ;;  %2785 = vmatmul.msk.bf16.gmra.mxu3 %vm228_vm0, %v3825_v53 }
  0xf7   :  { %vm956_vm2 = vcmp.eq.s32.totalorder %v3902_v12, %v864_v21  ;;  %v3922_v27 = vpack.c.bf16 %v648_v45, %v644_v34 }
  0xf8   :  { %v685_v28 = vmax.f32 %v319_v20, 0.0  ;;  %v686_v31 = vmax.f32 %v408_v25, 0.0  ;;  %vm2884_vm3 = vmpackc.low %vm956_vm2, %vm955_vm1 }
  0xfa   :  { %v3873_v35 = vpack.c.bf16 %v685_v28, %v681_v26  ;;  %v3876_v40 = vpack.c.bf16 %v686_v31, %v682_v30  ;;  %v471_v26 = vpop.f32.mrf.mxu2  ;;  %v643_v30 = vmax.f32 %v470_v15, 0.0  ;;  %v563_v63 = vpop.f32.mrf.mxu3  ;;  %2769 = vmatmul.msk.bf16.gmra.mxu2 %vm228_vm0, %v3825_v53 }
  0xfb   :  { %v472_v31 = vadd.f32 %v471_v26, %v3859_v16 }
  0xfd   :  { %v321_v43 = vpop.f32.mrf.mxu0  ;;  %v410_v46 = vpop.f32.mrf.mxu1  ;;  %v647_v39 = vmax.f32 %v472_v31, 0.0 }
  0xfe   :  { %v322_v58 = vadd.f32 %v321_v43, %v3633_v57  ;;  %v411_v0 = vadd.f32 %v410_v46, %v3641_v60  ;;  %v4676_v43 = vmov 1.0|1.0  }
  0xff   :  { %v3918_v46 = vpack.c.bf16 %v647_v39, %v643_v30  ;;  %v873_v39 = vpop.permute.xlu2 %872 }
 0x100   :  { %2739 = vmatmul.msk.bf16.gmra.mxu0 %vm228_vm0, %v3881_v36  ;;  %2755 = vmatmul.msk.bf16.gmra.mxu1 %vm228_vm0, %v3881_v36  ;;  %v689_v41 = vmax.f32 %v322_v58, 0.0  ;;  %v690_v14 = vmax.f32 %v411_v0, 0.0  ;;  %vm959_vm7 = vcmp.eq.s32.totalorder %v3902_v12, %v873_v39 }
 0x102   :  { %v474_v29 = vpop.f32.mrf.mxu2  ;;  %v565_v31 = vpop.f32.mrf.mxu3 }
 0x103   :  { %v475_v38 = vadd.f32 %v474_v29, %v3859_v16  ;;  %v566_v34 = vadd.f32 %v565_v31, %v3865_v32 }
 0x105   :  { %v323_v1 = vpop.f32.mrf.mxu0  ;;  %v412_v6 = vpop.f32.mrf.mxu1  ;;  %v651_v26 = vmax.f32 %v475_v38, 0.0  ;;  %v656_v42 = vmax.f32 %v566_v34, 0.0 }
 0x106   :  { %v324_v5 = vadd.f32 %v323_v1, %v3633_v57  ;;  %v413_v11 = vadd.f32 %v412_v6, %v3641_v60  ;;  %2786 = vmatmul.msk.bf16.gmra.mxu3 %vm228_vm0, %v3846_v48 }
 0x108   :  { %v693_v13 = vmax.f32 %v324_v5, 0.0  ;;  %v694_v19 = vmax.f32 %v413_v11, 0.0  ;;  %v3218_v11 = vld [vmem:[%s4670_s5 + $0x110] sm:$0xff] }
 0x109   :  { %1570 = vmatpush.bf16.msrb.mxu2 %v3218_v11  ;;  %v876_v11 = vpop.permute.xlu2 %875 }
 0x10a   :  { %v3905_v20 = vpack.c.bf16 %v693_v13, %v689_v41  ;;  %v3908_v25 = vpack.c.bf16 %v694_v19, %v690_v14  ;;  %v3226_v41 = vld [vmem:[%s4670_s5 + $0x150] sm:$0xff]  ;;  %v870_v14 = vpop.permute.xlu1 %869  ;;  %v564_v19 = vadd.f32 %v563_v63, %v3865_v32  ;;  %v476_v21 = vpop.f32.mrf.mxu2  ;;  %vm960_vm8 = vcmp.eq.s32.totalorder %v3902_v12, %v876_v11  ;;  %2770 = vmatmul.msk.bf16.gmra.mxu2 %vm228_vm0, %v3846_v48  ;;  %v3216_v48 = vld [vmem:[%s4670_s5 + $0x100] sm:$0xff] }
 0x10b   :  { %1659 = vmatpush.bf16.msrb.mxu3 %v3226_v41  ;;  %vm958_vm5 = vcmp.eq.s32.totalorder %v3902_v12, %v870_v14  ;;  %v568_v63 = vpop.f32.mrf.mxu3  ;;  %vm2888_vm9 = vmpackc.low %vm960_vm8, %vm959_vm7 }
 0x10c   :  { %vm2886_vm6 = vmpackc.low %vm958_vm5, %vm957_vm4  ;;  %v569_v41 = vadd.f32 %v568_v63, %v3865_v32 }
 0x10d   :  { %v326_v28 = vpop.f32.mrf.mxu0  ;;  %v415_v54 = vpop.f32.mrf.mxu1 }
 0x10e   :  { %v327_v47 = vadd.f32 %v326_v28, %v3633_v57  ;;  %v416_v49 = vadd.f32 %v415_v54, %v3641_v60  ;;  %v477_v28 = vadd.f32 %v476_v21, %v3859_v16  ;;  %v652_v54 = vmax.f32 %v564_v19, 0.0 }
 0x10f   :  { %v660_v31 = vmax.f32 %v569_v41, 0.0 }
 0x110   :  { %2885 = vmatmul.msk.bf16.vlgmr.msrb.gmra.mxu0 %vm2884_vm3, %v4676_v43  ;;  %2917 = vmatmul.msk.bf16.vlgmr.msrb.gmra.mxu1 %vm2884_vm3, %v4676_v43  ;;  %v697_v1 = vmax.f32 %v327_v47, 0.0  ;;  %v698_v6 = vmax.f32 %v416_v49, 0.0  ;;  %v655_v33 = vmax.f32 %v477_v28, 0.0  ;;  %v3952_v45 = vpack.c.bf16 %v656_v42, %v652_v54 }
 0x112   :  { %v3948_v44 = vpack.c.bf16 %v655_v33, %v651_v26  ;;  %v479_v29 = vpop.f32.mrf.mxu2  ;;  %v882_v41 = vpop.permute.xlu1 %881 }
 0x113   :  { %v480_v4 = vadd.f32 %v479_v29, %v3859_v16  ;;  %vm962_vm10 = vcmp.eq.s32.totalorder %v3902_v12, %v882_v41 }
 0x115   :  { %v328_v55 = vpop.f32.mrf.mxu0  ;;  %v417_v58 = vpop.f32.mrf.mxu1 }
 0x116   :  { %v329_v59 = vadd.f32 %v328_v55, %v3633_v57  ;;  %v418_v0 = vadd.f32 %v417_v58, %v3641_v60 }
 0x118   :  { %v701_v5 = vmax.f32 %v329_v59, 0.0  ;;  %v702_v8 = vmax.f32 %v418_v0, 0.0 }
 0x11a   :  { %v3935_v13 = vpack.c.bf16 %v701_v5, %v697_v1  ;;  %v3938_v15 = vpack.c.bf16 %v702_v8, %v698_v6  ;;  %v481_v19 = vpop.f32.mrf.mxu2  ;;  %2771 = vmatmul.msk.bf16.gmra.mxu2 %vm228_vm0, %v3881_v36 }
 0x11b   :  { %v482_v26 = vadd.f32 %v481_v19, %v3859_v16  ;;  %v879_v19 = vpop.permute.xlu0 %878 }
 0x11c   :  { %vm961_vm11 = vcmp.eq.s32.totalorder %v3902_v12, %v879_v19 }
 0x11d   :  { %v331_v24 = vpop.f32.mrf.mxu0  ;;  %v420_v30 = vpop.f32.mrf.mxu1  ;;  %v663_v54 = vmax.f32 %v482_v26, 0.0  ;;  %vm2890_vm12 = vmpackc.low %vm962_vm10, %vm961_vm11 }
 0x11e   :  { %v332_v47 = vadd.f32 %v331_v24, %v3633_v57  ;;  %v421_v49 = vadd.f32 %v420_v30, %v3641_v60  ;;  %v659_v24 = vmax.f32 %v480_v4, 0.0  ;;  %v570_v30 = vpop.f32.mrf.mxu3  ;;  %v3225_v4 = vld [vmem:[%s4670_s5 + $0x148] sm:$0xff]  ;;  %2787 = vmatmul.msk.bf16.gmra.mxu3 %vm228_vm0, %v3881_v36 }
 0x11f   :  { %v571_v33 = vadd.f32 %v570_v30, %v3865_v32  ;;  %1660 = vmatpush.bf16.msrb.mxu3 %v3225_v4 }
 0x120   :  { %2887 = vmatmul.msk.bf16.gmra.mxu0 %vm2886_vm6, %v4676_v43  ;;  %2919 = vmatmul.msk.bf16.gmra.mxu1 %vm2886_vm6, %v4676_v43  ;;  %v705_v1 = vmax.f32 %v332_v47, 0.0  ;;  %v706_v6 = vmax.f32 %v421_v49, 0.0  ;;  %v3972_v39 = vpack.c.bf16 %v663_v54, %v659_v24 }
 0x121   :  { %v664_v34 = vmax.f32 %v571_v33, 0.0 }
 0x122   :  { %v3979_v29 = vpop.f32.mrf.mxu2 }
 0x123   :  { %v3976_v42 = vpack.c.bf16 %v664_v34, %v660_v31  ;;  %v888_v53 = vpop.permute.xlu0 %887 }
 0x124   :  { %vm964_vm13 = vcmp.eq.s32.totalorder %v3902_v12, %v888_v53 }
 0x125   :  { %v333_v55 = vpop.f32.mrf.mxu0  ;;  %v422_v58 = vpop.f32.mrf.mxu1 }
 0x126   :  { %v334_v59 = vadd.f32 %v333_v55, %v3633_v57  ;;  %v423_v0 = vadd.f32 %v422_v58, %v3641_v60  ;;  %v3983_v63 = vpop.f32.mrf.mxu3 }
 0x128   :  { %v709_v5 = vmax.f32 %v334_v59, 0.0  ;;  %v710_v8 = vmax.f32 %v423_v0, 0.0 }
 0x12a   :  { %v3959_v38 = vpack.c.bf16 %v709_v5, %v705_v1  ;;  %v3962_v14 = vpack.c.bf16 %v710_v8, %v706_v6  ;;  %v3217_v8 = vld [vmem:[%s4670_s5 + $0x108] sm:$0xff]  ;;  %v3998_v24 = vpop.f32.mrf.mxu2 }
 0x12b   :  { %1571 = vmatpush.bf16.msrb.mxu2 %v3217_v8 }
 0x12d   :  { %v336_v21 = vpop.f32.mrf.mxu0  ;;  %v425_v28 = vpop.f32.mrf.mxu1 }
 0x12e   :  { %v337_v47 = vadd.f32 %v336_v21, %v3633_v57  ;;  %v426_v49 = vadd.f32 %v425_v28, %v3641_v60  ;;  %v4000_v30 = vpop.f32.mrf.mxu3 }
 0x12f   :  { %1572 = vmatpush.bf16.msrb.mxu2 %v3216_v48 }
 0x130   :  { %2889 = vmatmul.msk.bf16.gmra.mxu0 %vm2888_vm9, %v4676_v43  ;;  %2921 = vmatmul.msk.bf16.gmra.mxu1 %vm2888_vm9, %v4676_v43  ;;  %v713_v1 = vmax.f32 %v337_v47, 0.0  ;;  %v714_v6 = vmax.f32 %v426_v49, 0.0 }
 0x132   :  { %v4009_v54 = vpop.f32.mrf.mxu2 }
 0x135   :  { %v338_v55 = vpop.f32.mrf.mxu0  ;;  %v427_v58 = vpop.f32.mrf.mxu1 }
 0x136   :  { %v339_v59 = vadd.f32 %v338_v55, %v3633_v57  ;;  %v428_v0 = vadd.f32 %v427_v58, %v3641_v60  ;;  %v4013_v55 = vpop.f32.mrf.mxu3 }
 0x138   :  { %v717_v5 = vmax.f32 %v339_v59, 0.0  ;;  %v718_v23 = vmax.f32 %v428_v0, 0.0 }
 0x13a   :  { %v3992_v11 = vpack.c.bf16 %v717_v5, %v713_v1  ;;  %v3994_v21 = vpack.c.bf16 %v718_v23, %v714_v6  ;;  %v885_v23 = vpop.permute.xlu2 %884  ;;  %v4022_v4 = vpop.f32.mrf.mxu2 }
 0x13b   :  { %vm963_vm14 = vcmp.eq.s32.totalorder %v3902_v12, %v885_v23  ;;  %v3224_v23 = vld [vmem:[%s4670_s5 + $0x140] sm:$0xff] }
 0x13c   :  { %vm2892_vm15 = vmpackc.low %vm964_vm13, %vm963_vm14  ;;  %1661 = vmatpush.bf16.msrb.mxu3 %v3224_v23 }
 0x13d   :  { %v341_v26 = vpop.f32.mrf.mxu0  ;;  %v430_v28 = vpop.f32.mrf.mxu1 }
 0x13e   :  { %v342_v31 = vadd.f32 %v341_v26, %v3633_v57  ;;  %v431_v33 = vadd.f32 %v430_v28, %v3641_v60  ;;  %v4024_v26 = vpop.f32.mrf.mxu3 }
 0x13f   :  { %4678 = vst [vmem:[#allocation3_spill] sm:$0xff] %v4024_v26 }
 0x140   :  { %2891 = vmatmul.msk.bf16.gmra.mxu0 %vm2890_vm12, %v4676_v43  ;;  %2923 = vmatmul.msk.bf16.gmra.mxu1 %vm2890_vm12, %v4676_v43  ;;  %v721_v58 = vmax.f32 %v342_v31, 0.0  ;;  %v722_v1 = vmax.f32 %v431_v33, 0.0 }
 0x145   :  { %v343_v34 = vpop.f32.mrf.mxu0  ;;  %v432_v49 = vpop.f32.mrf.mxu1 }
 0x146   :  { %v344_v47 = vadd.f32 %v343_v34, %v3633_v57  ;;  %v433_v59 = vadd.f32 %v432_v49, %v3641_v60  ;;  %v4034_v34 = vpop.f32.mrf.mxu2 }
 0x147   :  { %4679 = vst [vmem:[#allocation4_spill] sm:$0xff] %v4034_v34 }
 0x148   :  { %v725_v0 = vmax.f32 %v344_v47, 0.0  ;;  %v726_v5 = vmax.f32 %v433_v59, 0.0  ;;  %v4037_v59 = vpop.f32.mrf.mxu3 }
 0x149   :  { %4680 = vst [vmem:[#allocation5_spill] sm:$0xff] %v4037_v59 }
 0x14a   :  { %v4016_v6 = vpack.c.bf16 %v725_v0, %v721_v58  ;;  %v4018_v8 = vpack.c.bf16 %v726_v5, %v722_v1 }
 0x14d   :  { %v346_v41 = vpop.f32.mrf.mxu0  ;;  %v435_v19 = vpop.f32.mrf.mxu1 }
 0x14e   :  { %v347_v28 = vadd.f32 %v346_v41, %v3633_v57  ;;  %v436_v31 = vadd.f32 %v435_v19, %v3641_v60  ;;  %v891_v19 = vpop.permute.xlu1 %890 }
 0x14f   :  { %vm965_vm1 = vcmp.eq.s32.totalorder %v3902_v12, %v891_v19 }
 0x150   :  { %2893 = vmatmul.msk.bf16.gmra.mxu0 %vm2892_vm15, %v4676_v43  ;;  %2925 = vmatmul.msk.bf16.gmra.mxu1 %vm2892_vm15, %v4676_v43  ;;  %v729_v0 = vmax.f32 %v347_v28, 0.0  ;;  %v730_v5 = vmax.f32 %v436_v31, 0.0 }
 0x155   :  { %v348_v33 = vpop.f32.mrf.mxu0  ;;  %v437_v49 = vpop.f32.mrf.mxu1 }
 0x156   :  { %v349_v47 = vadd.f32 %v348_v33, %v3633_v57  ;;  %v438_v58 = vadd.f32 %v437_v49, %v3641_v60  ;;  %v894_v33 = vpop.permute.xlu2 %893  ;;  %v4055_v49 = vpop.f32.mrf.mxu3 }
 0x157   :  { %vm966_vm2 = vcmp.eq.s32.totalorder %v3902_v12, %v894_v33  ;;  %4682 = vst [vmem:[#allocation7_spill] sm:$0xff] %v4055_v49  ;;  %v900_v36 = vpop.permute.xlu1 %899 }
 0x158   :  { %v733_v1 = vmax.f32 %v349_v47, 0.0  ;;  %v734_v53 = vmax.f32 %v438_v58, 0.0  ;;  %vm2894_vm3 = vmpackc.low %vm966_vm2, %vm965_vm1  ;;  %v4052_v47 = vpop.f32.mrf.mxu2  ;;  %vm968_vm0 = vcmp.eq.s32.totalorder %v3902_v12, %v900_v36 }
 0x159   :  { %4681 = vst [vmem:[#allocation6_spill] sm:$0xff] %v4052_v47 }
 0x15a   :  { %v4046_v41 = vpack.c.bf16 %v733_v1, %v729_v0  ;;  %v4048_v62 = vpack.c.bf16 %v734_v53, %v730_v5 }
 0x15d   :  { %v351_v28 = vpop.f32.mrf.mxu0  ;;  %v440_v31 = vpop.f32.mrf.mxu1 }
 0x15e   :  { %v352_v58 = vadd.f32 %v351_v28, %v3633_v57  ;;  %v441_v0 = vadd.f32 %v440_v31, %v3641_v60  ;;  %v4068_v59 = vpop.f32.mrf.mxu3  ;;  %v897_v28 = vpop.permute.xlu0 %896 }
 0x15f   :  { %4684 = vst [vmem:[#allocation9_spill] sm:$0xff] %v4068_v59  ;;  %vm967_vm4 = vcmp.eq.s32.totalorder %v3902_v12, %v897_v28 }
 0x160   :  { %2895 = vmatmul.msk.bf16.gmra.mxu0 %vm2894_vm3, %v4676_v43  ;;  %2927 = vmatmul.msk.bf16.gmra.mxu1 %vm2894_vm3, %v4676_v43  ;;  %v737_v23 = vmax.f32 %v352_v58, 0.0  ;;  %v738_v33 = vmax.f32 %v441_v0, 0.0  ;;  %v4066_v49 = vpop.f32.mrf.mxu2  ;;  %vm2896_vm5 = vmpackc.low %vm968_vm0, %vm967_vm4  ;;  %v4687_v58 = vmov 1.0|1.0  }
 0x161   :  { %4683 = vst [vmem:[#allocation8_spill] sm:$0xff] %v4066_v49 }
 0x165   :  { %v353_v1 = vpop.f32.mrf.mxu0  ;;  %v442_v53 = vpop.f32.mrf.mxu1 }
 0x166   :  { %v354_v5 = vadd.f32 %v353_v1, %v3633_v57  ;;  %v443_v48 = vadd.f32 %v442_v53, %v3641_v60  ;;  %v4081_v53 = vpop.f32.mrf.mxu3 }
 0x167   :  { %4689 = vst [vmem:[#allocation13_spill] sm:$0xff] %v4081_v53 }
 0x168   :  { %v741_v19 = vmax.f32 %v354_v5, 0.0  ;;  %v742_v43 = vmax.f32 %v443_v48, 0.0  ;;  %v4078_v0 = vpop.f32.mrf.mxu2 }
 0x169   :  { %4688 = vst [vmem:[#allocation12_spill] sm:$0xff] %v4078_v0  ;;  %v3207_v0 = vld [vmem:[%s4670_s5 + $0xb8] sm:$0xff] }
 0x16a   :  { %v4070_v47 = vpack.c.bf16 %v741_v19, %v737_v23  ;;  %v4072_v34 = vpack.c.bf16 %v742_v43, %v738_v33  ;;  %2113 = vmatpush.bf16.msra.mxu2 %v3207_v0 }
 0x16c   :  { %4685 = vst [vmem:[#allocation10_spill] sm:$0xff] %v4070_v47 }
 0x16d   :  { %4686 = vst [vmem:[#allocation11_spill] sm:$0xff] %v4072_v34  ;;  %v356_v31 = vpop.f32.mrf.mxu0  ;;  %v445_v1 = vpop.f32.mrf.mxu1 }
 0x16e   :  { %v357_v5 = vadd.f32 %v356_v31, %v3633_v57  ;;  %v446_v43 = vadd.f32 %v445_v1, %v3641_v60  ;;  %v3191_v31 = vld [vmem:[%s4670_s5 + $0x38] sm:$0xff]  ;;  %v4106_v47 = vpop.f32.mrf.mxu3 }
 0x16f   :  { %v3215_v1 = vld [vmem:[%s4670_s5 + $0xf8] sm:$0xff]  ;;  %1935 = vmatpush.bf16.msra.mxu0 %v3191_v31  ;;  %4693 = vst [vmem:[#allocation17_spill] sm:$0xff] %v4106_v47 }
 0x170   :  { %2897 = vmatmul.msk.bf16.gmra.mxu0 %vm2896_vm5, %v4687_v58  ;;  %2929 = vmatmul.msk.bf16.gmra.mxu1 %vm2896_vm5, %v4687_v58  ;;  %v745_v36 = vmax.f32 %v357_v5, 0.0  ;;  %v746_v59 = vmax.f32 %v446_v43, 0.0  ;;  %v906_v43 = vpop.permute.xlu0 %905  ;;  %v4104_v53 = vpop.f32.mrf.mxu2 }
 0x171   :  { %vm970_vm6 = vcmp.eq.s32.totalorder %v3902_v12, %v906_v43  ;;  %2202 = vmatpush.bf16.msra.mxu3 %v3215_v1  ;;  %4692 = vst [vmem:[#allocation16_spill] sm:$0xff] %v4104_v53 }
 0x175   :  { %v358_v48 = vpop.f32.mrf.mxu0  ;;  %v447_v19 = vpop.f32.mrf.mxu1 }
 0x176   :  { %v359_v23 = vadd.f32 %v358_v48, %v3633_v57  ;;  %v448_v33 = vadd.f32 %v447_v19, %v3641_v60  ;;  %v3199_v48 = vld [vmem:[%s4670_s5 + $0x78] sm:$0xff] }
 0x177   :  { %2024 = vmatpush.bf16.msra.mxu1 %v3199_v48 }
 0x178   :  { %v749_v28 = vmax.f32 %v359_v23, 0.0  ;;  %v750_v49 = vmax.f32 %v448_v33, 0.0  ;;  %v903_v23 = vpop.permute.xlu2 %902  ;;  %v4114_v1 = vpop.f32.mrf.mxu2 }
 0x179   :  { %vm969_vm7 = vcmp.eq.s32.totalorder %v3902_v12, %v903_v23  ;;  %v4116_v23 = vpop.f32.mrf.mxu3 }
 0x17a   :  { %v4098_v5 = vpack.c.bf16 %v749_v28, %v745_v36  ;;  %v4100_v19 = vpack.c.bf16 %v750_v49, %v746_v59  ;;  %vm2898_vm8 = vmpackc.low %vm970_vm6, %vm969_vm7 }
 0x17c   :  { %4690 = vst [vmem:[#allocation14_spill] sm:$0xff] %v4098_v5  ;;  %v909_v5 = vpop.permute.xlu1 %908 }
 0x17d   :  { %4691 = vst [vmem:[#allocation15_spill] sm:$0xff] %v4100_v19  ;;  %v361_v33 = vpop.f32.mrf.mxu0  ;;  %v450_v34 = vpop.f32.mrf.mxu1  ;;  %vm971_vm9 = vcmp.eq.s32.totalorder %v3902_v12, %v909_v5  ;;  %v3190_v5 = vld [vmem:[%s4670_s5 + $0x30] sm:$0xff] }
 0x17e   :  { %v362_v59 = vadd.f32 %v361_v33, %v3633_v57  ;;  %v451_v49 = vadd.f32 %v450_v34, %v3641_v60  ;;  %1936 = vmatpush.bf16.msra.mxu0 %v3190_v5 }
 0x180   :  { %2899 = vmatmul.msk.bf16.gmra.mxu0 %vm2898_vm8, %v4687_v58  ;;  %2931 = vmatmul.msk.bf16.gmra.mxu1 %vm2898_vm8, %v4687_v58  ;;  %v753_v48 = vmax.f32 %v362_v59, 0.0  ;;  %v754_v47 = vmax.f32 %v451_v49, 0.0  ;;  %v912_v33 = vpop.permute.xlu2 %911  ;;  %v4126_v34 = vpop.f32.mrf.mxu2 }
 0x181   :  { %vm972_vm10 = vcmp.eq.s32.totalorder %v3902_v12, %v912_v33  ;;  %v4128_v59 = vpop.f32.mrf.mxu3 }
 0x182   :  { %vm2900_vm11 = vmpackc.low %vm972_vm10, %vm971_vm9  ;;  %4694 = vst [vmem:[#allocation18_spill] sm:$0xff] %v4128_v59 }
 0x185   :  { %v363_v0 = vpop.f32.mrf.mxu0  ;;  %v452_v28 = vpop.f32.mrf.mxu1 }
 0x186   :  { %v364_v36 = vadd.f32 %v363_v0, %v3633_v57  ;;  %v453_v31 = vadd.f32 %v452_v28, %v3641_v60  ;;  %v3214_v28 = vld [vmem:[%s4670_s5 + $0xf0] sm:$0xff] }
 0x187   :  { %2203 = vmatpush.bf16.msra.mxu3 %v3214_v28 }
 0x188   :  { %v757_v43 = vmax.f32 %v364_v36, 0.0  ;;  %v758_v53 = vmax.f32 %v453_v31, 0.0  ;;  %v918_v31 = vpop.permute.xlu1 %917  ;;  %v4142_v33 = vpop.f32.mrf.mxu2 }
 0x189   :  { %4695 = vst [vmem:[#allocation19_spill] sm:$0xff] %v4142_v33  ;;  %vm974_vm12 = vcmp.eq.s32.totalorder %v3902_v12, %v918_v31  ;;  %v921_v28 = vpop.permute.xlu2 %920 }
 0x18a   :  { %v4118_v19 = vpack.c.bf16 %v757_v43, %v753_v48  ;;  %v4120_v26 = vpack.c.bf16 %v758_v53, %v754_v47  ;;  %v3206_v53 = vld [vmem:[%s4670_s5 + $0xb0] sm:$0xff]  ;;  %v915_v43 = vpop.permute.xlu0 %914  ;;  %vm975_vm1 = vcmp.eq.s32.totalorder %v3902_v12, %v921_v28  ;;  %v3189_v28 = vld [vmem:[%s4670_s5 + $0x28] sm:$0xff] }
 0x18b   :  { %v3198_v48 = vld [vmem:[%s4670_s5 + $0x70] sm:$0xff]  ;;  %2114 = vmatpush.bf16.msra.mxu2 %v3206_v53  ;;  %vm973_vm13 = vcmp.eq.s32.totalorder %v3902_v12, %v915_v43  ;;  %1937 = vmatpush.bf16.msra.mxu0 %v3189_v28 }
 0x18c   :  { %2025 = vmatpush.bf16.msra.mxu1 %v3198_v48  ;;  %vm2902_vm14 = vmpackc.low %vm974_vm12, %vm973_vm13 }
 0x18d   :  { %v1172_v57 = vpop.f32.mrf.mxu0  ;;  %v1261_v60 = vpop.f32.mrf.mxu1 }
 0x190   :  { %2901 = vmatmul.msk.bf16.gmra.mxu0 %vm2900_vm11, %v4687_v58  ;;  %2933 = vmatmul.msk.bf16.gmra.mxu1 %vm2900_vm11, %v4687_v58 }
 0x192   :  { %v924_v43 = vpop.permute.xlu0 %923 }
 0x193   :  { %vm976_vm15 = vcmp.eq.s32.totalorder %v3902_v12, %v924_v43  ;;  %v3205_v43 = vld [vmem:[%s4670_s5 + $0xa8] sm:$0xff] }
 0x194   :  { %vm2904_vm2 = vmpackc.low %vm976_vm15, %vm975_vm1  ;;  %2115 = vmatpush.bf16.msra.mxu2 %v3205_v43 }
 0x195   :  { %v1174_v49 = vpop.f32.mrf.mxu0  ;;  %v1263_v36 = vpop.f32.mrf.mxu1 }
 0x196   :  { %v1341_v0 = vpack.c.bf16 %v1174_v49, %v1172_v57  ;;  %v1342_v47 = vpack.c.bf16 %v1263_v36, %v1261_v60  ;;  %v4146_v57 = vpop.f32.mrf.mxu3  ;;  %v4150_v36 = vpop.f32.mrf.mxu2 }
 0x197   :  { %4696 = vst [vmem:[#allocation20_spill] sm:$0xff] %v4146_v57 }
 0x198   :  { %1573 = vmatmul.bf16.vlgmr.msrb.gmra.mxu2 %v1341_v0  ;;  %1662 = vmatmul.bf16.vlgmr.msrb.gmra.mxu3 %v1342_v47  ;;  %4697 = vst [vmem:[#allocation21_spill] sm:$0xff] %v4150_v36 }
 0x19d   :  { %v1177_v60 = vpop.f32.mrf.mxu0  ;;  %v1266_v49 = vpop.f32.mrf.mxu1 }
 0x19e   :  { %v4152_v5 = vpop.f32.mrf.mxu3  ;;  %v4156_v59 = vpop.f32.mrf.mxu2 }
 0x19f   :  { %4698 = vst [vmem:[#allocation22_spill] sm:$0xff] %v4152_v5 }
 0x1a0   :  { %2903 = vmatmul.msk.bf16.gmra.mxu0 %vm2902_vm14, %v4687_v58  ;;  %2935 = vmatmul.msk.bf16.gmra.mxu1 %vm2902_vm14, %v4687_v58  ;;  %4699 = vst [vmem:[#allocation23_spill] sm:$0xff] %v4156_v59 }
 0x1a5   :  { %v1179_v0 = vpop.f32.mrf.mxu0  ;;  %v1268_v53 = vpop.f32.mrf.mxu1 }
 0x1a6   :  { %v1343_v47 = vpack.c.bf16 %v1179_v0, %v1177_v60  ;;  %v1344_v31 = vpack.c.bf16 %v1268_v53, %v1266_v49  ;;  %v4159_v60 = vpop.f32.mrf.mxu3 }
 0x1a7   :  { %4700 = vst [vmem:[#allocation24_spill] sm:$0xff] %v4159_v60  ;;  %v3213_v60 = vld [vmem:[%s4670_s5 + $0xe8] sm:$0xff] }
 0x1a8   :  { %1578 = vmatmul.bf16.gmra.mxu2 %v1343_v47  ;;  %1667 = vmatmul.bf16.gmra.mxu3 %v1344_v31  ;;  %v4162_v31 = vpop.f32.mrf.mxu2 }
 0x1a9   :  { %4701 = vst [vmem:[#allocation25_spill] sm:$0xff] %v4162_v31  ;;  %2204 = vmatpush.bf16.msra.mxu3 %v3213_v60  ;;  %v933_v60 = vpop.permute.xlu0 %932 }
 0x1aa   :  { %vm979_vm6 = vcmp.eq.s32.totalorder %v3902_v12, %v933_v60  ;;  %v3204_v60 = vld [vmem:[%s4670_s5 + $0xa0] sm:$0xff] }
 0x1ab   :  { %2116 = vmatpush.bf16.msra.mxu2 %v3204_v60  ;;  %v3195_v60 = vld [vmem:[%s4670_s5 + $0x58] sm:$0xff] }
 0x1ad   :  { %v1182_v48 = vpop.f32.mrf.mxu0  ;;  %v1271_v57 = vpop.f32.mrf.mxu1 }
 0x1ae   :  { %v4173_v5 = vpop.f32.mrf.mxu3 }
 0x1af   :  { %4702 = vst [vmem:[#allocation26_spill] sm:$0xff] %v4173_v5 }
 0x1b0   :  { %2905 = vmatmul.msk.bf16.gmra.mxu0 %vm2904_vm2, %v4687_v58  ;;  %2937 = vmatmul.msk.bf16.gmra.mxu1 %vm2904_vm2, %v4687_v58  ;;  %vm2600_vm2 = vcmask 1040384  }
 0x1b5   :  { %v1184_v49 = vpop.f32.mrf.mxu0  ;;  %v1273_v47 = vpop.f32.mrf.mxu1 }
 0x1b6   :  { %v1345_v0 = vpack.c.bf16 %v1184_v49, %v1182_v48  ;;  %v1346_v53 = vpack.c.bf16 %v1273_v47, %v1271_v57  ;;  %v3197_v57 = vld [vmem:[%s4670_s5 + $0x68] sm:$0xff]  ;;  %v927_v48 = vpop.permute.xlu1 %926  ;;  %v930_v49 = vpop.permute.xlu2 %929 }
 0x1b7   :  { %vm977_vm3 = vcmp.eq.s32.totalorder %v3902_v12, %v927_v48  ;;  %vm978_vm0 = vcmp.eq.s32.totalorder %v3902_v12, %v930_v49  ;;  %2026 = vmatpush.bf16.msra.mxu1 %v3197_v57  ;;  %v4184_v5 = vpop.f32.mrf.mxu3 }
 0x1b8   :  { %1583 = vmatmul.bf16.gmra.mxu2 %v1345_v0  ;;  %1672 = vmatmul.bf16.gmra.mxu3 %v1346_v53  ;;  %vm2906_vm4 = vmpackc.low %vm978_vm0, %vm977_vm3  ;;  %v4182_v53 = vpop.f32.mrf.mxu2  ;;  %4703 = vst [vmem:[#allocation27_spill] sm:$0xff] %v4184_v5 }
 0x1bd   :  { %v1187_v0 = vpop.f32.mrf.mxu0  ;;  %v1276_v47 = vpop.f32.mrf.mxu1 }
 0x1be   :  { %v936_v48 = vpop.permute.xlu1 %935 }
 0x1bf   :  { %vm980_vm5 = vcmp.eq.s32.totalorder %v3902_v12, %v936_v48  ;;  %v4190_v33 = vpop.f32.mrf.mxu3  ;;  %v939_v48 = vpop.permute.xlu2 %938 }
 0x1c0   :  { %2907 = vmatmul.msk.bf16.gmra.mxu0 %vm2906_vm4, %v4687_v58  ;;  %2939 = vmatmul.msk.bf16.gmra.mxu1 %vm2906_vm4, %v4687_v58  ;;  %v4188_v49 = vpop.f32.mrf.mxu2  ;;  %4705 = vst [vmem:[#allocation29_spill] sm:$0xff] %v4190_v33  ;;  %vm2908_vm7 = vmpackc.low %vm980_vm5, %vm979_vm6  ;;  %v3188_v33 = vld [vmem:[%s4670_s5 + $0x20] sm:$0xff]  ;;  %vm981_vm9 = vcmp.eq.s32.totalorder %v3902_v12, %v939_v48 }
 0x1c1   :  { %4704 = vst [vmem:[#allocation28_spill] sm:$0xff] %v4188_v49  ;;  %1938 = vmatpush.bf16.msra.mxu0 %v3188_v33 }
 0x1c5   :  { %v1189_v31 = vpop.f32.mrf.mxu0  ;;  %v1278_v28 = vpop.f32.mrf.mxu1 }
 0x1c6   :  { %v1347_v43 = vpack.c.bf16 %v1189_v31, %v1187_v0  ;;  %v1348_v59 = vpack.c.bf16 %v1278_v28, %v1276_v47 }
 0x1c7   :  { %v4196_v28 = vpop.f32.mrf.mxu3 }
 0x1c8   :  { %1588 = vmatmul.bf16.gmra.mxu2 %v1347_v43  ;;  %1677 = vmatmul.bf16.gmra.mxu3 %v1348_v59  ;;  %v4194_v43 = vpop.f32.mrf.mxu2  ;;  %4707 = vst [vmem:[#allocation31_spill] sm:$0xff] %v4196_v28 }
 0x1c9   :  { %4706 = vst [vmem:[#allocation30_spill] sm:$0xff] %v4194_v43 }
 0x1cd   :  { %v1192_v57 = vpop.f32.mrf.mxu0  ;;  %v1281_v36 = vpop.f32.mrf.mxu1 }
 0x1cf   :  { %v4222_v48 = vpop.f32.mrf.mxu3 }
 0x1d0   :  { %2909 = vmatmul.msk.bf16.gmra.mxu0 %vm2908_vm7, %v4687_v58  ;;  %2941 = vmatmul.msk.bf16.gmra.mxu1 %vm2908_vm7, %v4687_v58  ;;  %v4220_v33 = vpop.f32.mrf.mxu2  ;;  %4709 = vst [vmem:[#allocation33_spill] sm:$0xff] %v4222_v48  ;;  %v948_v48 = vpop.permute.xlu2 %947 }
 0x1d1   :  { %4708 = vst [vmem:[#allocation32_spill] sm:$0xff] %v4220_v33  ;;  %v945_v33 = vpop.permute.xlu1 %944  ;;  %vm984_vm12 = vcmp.eq.s32.totalorder %v3902_v12, %v948_v48 }
 0x1d2   :  { %vm983_vm11 = vcmp.eq.s32.totalorder %v3902_v12, %v945_v33 }
 0x1d3   :  { %vm2912_vm13 = vmpackc.low %vm984_vm12, %vm983_vm11 }
 0x1d5   :  { %v1194_v31 = vpop.f32.mrf.mxu0  ;;  %v1283_v59 = vpop.f32.mrf.mxu1 }
 0x1d6   :  { %v1349_v0 = vpack.c.bf16 %v1194_v31, %v1192_v57  ;;  %v1350_v47 = vpack.c.bf16 %v1283_v59, %v1281_v36  ;;  %v3212_v57 = vld [vmem:[%s4670_s5 + $0xe0] sm:$0xff]  ;;  %v942_v31 = vpop.permute.xlu0 %941 }
 0x1d7   :  { %v3196_v36 = vld [vmem:[%s4670_s5 + $0x60] sm:$0xff]  ;;  %vm982_vm8 = vcmp.eq.s32.totalorder %v3902_v12, %v942_v31  ;;  %2205 = vmatpush.bf16.msra.mxu3 %v3212_v57  ;;  %v3186_v57 = vld [vmem:[%s4670_s5 + $0x10] sm:$0xff] }
 0x1d8   :  { %1593 = vmatmul.bf16.gmra.mxu2 %v1349_v0  ;;  %1682 = vmatmul.bf16.gmra.mxu3 %v1350_v47  ;;  %vm2910_vm10 = vmpackc.low %vm982_vm8, %vm981_vm9  ;;  %v3187_v47 = vld [vmem:[%s4670_s5 + $0x18] sm:$0xff]  ;;  %v4236_v5 = vpop.f32.mrf.mxu2 }
 0x1d9   :  { %2027 = vmatpush.bf16.msra.mxu1 %v3196_v36  ;;  %1939 = vmatpush.bf16.msra.mxu0 %v3187_v47  ;;  %v3194_v36 = vld [vmem:[%s4670_s5 + $0x50] sm:$0xff]  ;;  %v3185_v47 = vld [vmem:[%s4670_s5 + $0x8] sm:$0xff] }
 0x1dd   :  { %v1197_v0 = vpop.f32.mrf.mxu0  ;;  %v1286_v59 = vpop.f32.mrf.mxu1  ;;  %2028 = vmatpush.bf16.msra.mxu1 %v3195_v60  ;;  %1940 = vmatpush.bf16.msra.mxu0 %v3186_v57  ;;  %v3193_v60 = vld [vmem:[%s4670_s5 + $0x48] sm:$0xff] }
 0x1e0   :  { %2911 = vmatmul.msk.bf16.gmra.mxu0 %vm2910_vm10, %v4687_v58  ;;  %2943 = vmatmul.msk.bf16.gmra.mxu1 %vm2910_vm10, %v4687_v58  ;;  %v4250_v33 = vpop.f32.mrf.mxu2 }
 0x1e1   :  { %2029 = vmatpush.bf16.msra.mxu1 %v3194_v36  ;;  %1941 = vmatpush.bf16.msra.mxu0 %v3185_v47 }
 0x1e5   :  { %v1199_v31 = vpop.f32.mrf.mxu0  ;;  %v1288_v43 = vpop.f32.mrf.mxu1  ;;  %2030 = vmatpush.bf16.msra.mxu1 %v3193_v60 }
 0x1e6   :  { %v1351_v28 = vpack.c.bf16 %v1199_v31, %v1197_v0  ;;  %v1352_v49 = vpack.c.bf16 %v1288_v43, %v1286_v59  ;;  %v4240_v43 = vpop.f32.mrf.mxu3  ;;  %v3192_v0 = vld [vmem:[%s4670_s5 + $0x40] sm:$0xff]  ;;  %v951_v60 = vpop.permute.xlu0 %950 }
 0x1e7   :  { %4710 = vst [vmem:[#allocation34_spill] sm:$0xff] %v4240_v43  ;;  %v954_v43 = vpop.permute.xlu1 %953  ;;  %vm985_vm15 = vcmp.eq.s32.totalorder %v3902_v12, %v951_v60 }
 0x1e8   :  { %1598 = vmatmul.bf16.gmra.mxu2 %v1351_v28  ;;  %1687 = vmatmul.bf16.gmra.mxu3 %v1352_v49  ;;  %v3184_v28 = vld [vmem:[%s4670_s5] sm:$0xff]  ;;  %vm986_vm14 = vcmp.eq.s32.totalorder %v3902_v12, %v954_v43 }
 0x1e9   :  { %1942 = vmatpush.bf16.msra.mxu0 %v3184_v28  ;;  %2031 = vmatpush.bf16.msra.mxu1 %v3192_v0  ;;  %v3203_v28 = vld [vmem:[%s4670_s5 + $0x98] sm:$0xff]  ;;  %vm2914_vm1 = vmpackc.low %vm986_vm14, %vm985_vm15 }
 0x1ea   :  { %v3211_v0 = vld [vmem:[%s4670_s5 + $0xd8] sm:$0xff]  ;;  %2117 = vmatpush.bf16.msra.mxu2 %v3203_v28 }
 0x1eb   :  { %2206 = vmatpush.bf16.msra.mxu3 %v3211_v0 }
 0x1ed   :  { %v1202_v49 = vpop.f32.mrf.mxu0  ;;  %v1291_v59 = vpop.f32.mrf.mxu1 }
 0x1ee   :  { %v4252_v57 = vpop.f32.mrf.mxu3 }
 0x1ef   :  { %4711 = vst [vmem:[#allocation35_spill] sm:$0xff] %v4252_v57 }
 0x1f0   :  { %2913 = vmatmul.msk.bf16.gmra.mxu0 %vm2912_vm13, %v4687_v58  ;;  %2945 = vmatmul.msk.bf16.gmra.mxu1 %vm2912_vm13, %v4687_v58 }
 0x1f5   :  { %v1204_v48 = vpop.f32.mrf.mxu0  ;;  %v1293_v31 = vpop.f32.mrf.mxu1 }
 0x1f6   :  { %v1353_v36 = vpack.c.bf16 %v1204_v48, %v1202_v49  ;;  %v1354_v47 = vpack.c.bf16 %v1293_v31, %v1291_v59  ;;  %v4262_v48 = vpop.f32.mrf.mxu2 }
 0x1f7   :  { %4712 = vst [vmem:[#allocation36_spill] sm:$0xff] %v4262_v48 }
 0x1f8   :  { %1603 = vmatmul.bf16.gmra.mxu2 %v1353_v36  ;;  %1692 = vmatmul.bf16.gmra.mxu3 %v1354_v47  ;;  %v4264_v36 = vpop.f32.mrf.mxu3 }
 0x1f9   :  { %4713 = vst [vmem:[#allocation37_spill] sm:$0xff] %v4264_v36 }
 0x1fd   :  { %v1207_v49 = vpop.f32.mrf.mxu0  ;;  %v1296_v59 = vpop.f32.mrf.mxu1 }
 0x1fe   :  { %v4268_v0 = vpop.f32.mrf.mxu2 }
 0x1ff   :  { %4714 = vst [vmem:[#allocation38_spill] sm:$0xff] %v4268_v0 }
 0x200   :  { %2915 = vmatmul.msk.bf16.gmra.mxu0 %vm2914_vm1, %v4687_v58  ;;  %2947 = vmatmul.msk.bf16.gmra.mxu1 %vm2914_vm1, %v4687_v58  ;;  %v4270_v12 = vpop.f32.mrf.mxu3 }
 0x201   :  { %4715 = vst [vmem:[#allocation39_spill] sm:$0xff] %v4270_v12 }
 0x205   :  { %v1209_v31 = vpop.f32.mrf.mxu0  ;;  %v1298_v57 = vpop.f32.mrf.mxu1 }
 0x206   :  { %v1355_v47 = vpack.c.bf16 %v1209_v31, %v1207_v49  ;;  %v1356_v28 = vpack.c.bf16 %v1298_v57, %v1296_v59  ;;  %v4274_v36 = vpop.f32.mrf.mxu2  ;;  %v3202_v59 = vld [vmem:[%s4670_s5 + $0x90] sm:$0xff] }
 0x207   :  { %4716 = vst [vmem:[#allocation40_spill] sm:$0xff] %v4274_v36  ;;  %2118 = vmatpush.bf16.msra.mxu2 %v3202_v59 }
 0x208   :  { %1608 = vmatmul.bf16.gmra.mxu2 %v1355_v47  ;;  %1697 = vmatmul.bf16.gmra.mxu3 %v1356_v28  ;;  %v4276_v48 = vpop.f32.mrf.mxu3 }
 0x209   :  { %4717 = vst [vmem:[#allocation41_spill] sm:$0xff] %v4276_v48 }
 0x20d   :  { %v1212_v43 = vpop.f32.mrf.mxu0  ;;  %v1301_v60 = vpop.f32.mrf.mxu1 }
 0x210   :  { %1943 = vmatmul.bf16.vlgmr.msra.gmra.mxu0 %v3677_v17  ;;  %2032 = vmatmul.bf16.vlgmr.msra.gmra.mxu1 %v3679_v18  ;;  %v3210_v17 = vld [vmem:[%s4670_s5 + $0xd0] sm:$0xff] }
 0x211   :  { %2207 = vmatpush.bf16.msra.mxu3 %v3210_v17 }
 0x215   :  { %v1214_v58 = vpop.f32.mrf.mxu0  ;;  %v1303_v31 = vpop.f32.mrf.mxu1 }
 0x216   :  { %v1357_v49 = vpack.c.bf16 %v1214_v58, %v1212_v43  ;;  %v1358_v57 = vpack.c.bf16 %v1303_v31, %v1301_v60 }
 0x218   :  { %1613 = vmatmul.bf16.gmra.mxu2 %v1357_v49  ;;  %1702 = vmatmul.bf16.gmra.mxu3 %v1358_v57 }
 0x21b   :  { %v1574_v47 = vpop.f32.mrf.mxu2  ;;  %v1663_v18 = vpop.f32.mrf.mxu3 }
 0x21c   :  { %v4284_v28 = vadd.f32 %v1663_v18, %v1574_v47 }
 0x21d   :  { %v1217_v48 = vpop.f32.mrf.mxu0  ;;  %v1306_v43 = vpop.f32.mrf.mxu1 }
 0x220   :  { %1948 = vmatmul.bf16.gmra.mxu0 %v3704_v37  ;;  %2037 = vmatmul.bf16.gmra.mxu1 %v3706_v52 }
 0x223   :  { %v1576_v60 = vpop.f32.mrf.mxu2  ;;  %v1665_v58 = vpop.f32.mrf.mxu3 }
 0x224   :  { %v4288_v49 = vadd.f32 %v1665_v58, %v1576_v60 }
 0x225   :  { %v1219_v31 = vpop.f32.mrf.mxu0  ;;  %v1308_v12 = vpop.f32.mrf.mxu1 }
 0x226   :  { %v1359_v57 = vpack.c.bf16 %v1219_v31, %v1217_v48  ;;  %v1360_v36 = vpack.c.bf16 %v1308_v12, %v1306_v43 }
 0x228   :  { %1618 = vmatmul.bf16.gmra.mxu2 %v1359_v57  ;;  %1707 = vmatmul.bf16.gmra.mxu3 %v1360_v36  ;;  %v3201_v36 = vld [vmem:[%s4670_s5 + $0x88] sm:$0xff] }
 0x229   :  { %2119 = vmatpush.bf16.msra.mxu2 %v3201_v36 }
 0x22b   :  { %v1579_v59 = vpop.f32.mrf.mxu2  ;;  %v1668_v17 = vpop.f32.mrf.mxu3 }
 0x22c   :  { %v4290_v47 = vadd.f32 %v1668_v17, %v1579_v59 }
 0x22d   :  { %v1222_v18 = vpop.f32.mrf.mxu0  ;;  %v1311_v0 = vpop.f32.mrf.mxu1 }
 0x230   :  { %1953 = vmatmul.bf16.gmra.mxu0 %v3749_v2  ;;  %2042 = vmatmul.bf16.gmra.mxu1 %v3751_v3  ;;  %v3209_v2 = vld [vmem:[%s4670_s5 + $0xc8] sm:$0xff] }
 0x231   :  { %2208 = vmatpush.bf16.msra.mxu3 %v3209_v2 }
 0x233   :  { %v1581_v37 = vpop.f32.mrf.mxu2  ;;  %v1670_v52 = vpop.f32.mrf.mxu3 }
 0x234   :  { %v4294_v60 = vadd.f32 %v1670_v52, %v1581_v37 }
 0x235   :  { %v1224_v58 = vpop.f32.mrf.mxu0  ;;  %v1313_v31 = vpop.f32.mrf.mxu1 }
 0x236   :  { %v1361_v48 = vpack.c.bf16 %v1224_v58, %v1222_v18  ;;  %v1362_v12 = vpack.c.bf16 %v1313_v31, %v1311_v0 }
 0x238   :  { %1623 = vmatmul.bf16.gmra.mxu2 %v1361_v48  ;;  %1712 = vmatmul.bf16.gmra.mxu3 %v1362_v12 }
 0x23b   :  { %v1584_v43 = vpop.f32.mrf.mxu2  ;;  %v1673_v3 = vpop.f32.mrf.mxu3 }
 0x23c   :  { %v4302_v57 = vadd.f32 %v1673_v3, %v1584_v43 }
 0x23d   :  { %v1227_v59 = vpop.f32.mrf.mxu0  ;;  %v1316_v17 = vpop.f32.mrf.mxu1 }
 0x240   :  { %1958 = vmatmul.bf16.gmra.mxu0 %v3776_v22  ;;  %2047 = vmatmul.bf16.gmra.mxu1 %v3778_v7 }
 0x243   :  { %v1586_v0 = vpop.f32.mrf.mxu2  ;;  %v1675_v18 = vpop.f32.mrf.mxu3 }
 0x244   :  { %v4306_v37 = vadd.f32 %v1675_v18, %v1586_v0 }
 0x245   :  { %v1229_v52 = vpop.f32.mrf.mxu0  ;;  %v1318_v48 = vpop.f32.mrf.mxu1 }
 0x246   :  { %v1363_v58 = vpack.c.bf16 %v1229_v52, %v1227_v59  ;;  %v1364_v31 = vpack.c.bf16 %v1318_v48, %v1316_v17 }
 0x248   :  { %1628 = vmatmul.bf16.gmra.mxu2 %v1363_v58  ;;  %1717 = vmatmul.bf16.gmra.mxu3 %v1364_v31  ;;  %v3200_v58 = vld [vmem:[%s4670_s5 + $0x80] sm:$0xff] }
 0x249   :  { %2120 = vmatpush.bf16.msra.mxu2 %v3200_v58 }
 0x24b   :  { %v1589_v12 = vpop.f32.mrf.mxu2  ;;  %v1678_v36 = vpop.f32.mrf.mxu3 }
 0x24c   :  { %v4308_v2 = vadd.f32 %v1678_v36, %v1589_v12 }
 0x24d   :  { %v1232_v43 = vpop.f32.mrf.mxu0  ;;  %v1321_v3 = vpop.f32.mrf.mxu1 }
 0x250   :  { %1963 = vmatmul.bf16.gmra.mxu0 %v3818_v50  ;;  %2052 = vmatmul.bf16.gmra.mxu1 %v3820_v51  ;;  %v3208_v50 = vld [vmem:[%s4670_s5 + $0xc0] sm:$0xff] }
 0x251   :  { %2209 = vmatpush.bf16.msra.mxu3 %v3208_v50 }
 0x253   :  { %v1591_v22 = vpop.f32.mrf.mxu2  ;;  %v1680_v7 = vpop.f32.mrf.mxu3 }
 0x254   :  { %v4312_v0 = vadd.f32 %v1680_v7, %v1591_v22 }
 0x255   :  { %v1234_v18 = vpop.f32.mrf.mxu0  ;;  %v1323_v52 = vpop.f32.mrf.mxu1 }
 0x256   :  { %v1365_v59 = vpack.c.bf16 %v1234_v18, %v1232_v43  ;;  %v1366_v17 = vpack.c.bf16 %v1323_v52, %v1321_v3 }
 0x258   :  { %1633 = vmatmul.bf16.gmra.mxu2 %v1365_v59  ;;  %1722 = vmatmul.bf16.gmra.mxu3 %v1366_v17 }
 0x25b   :  { %v1594_v48 = vpop.f32.mrf.mxu2  ;;  %v1683_v51 = vpop.f32.mrf.mxu3 }
 0x25c   :  { %v4320_v31 = vadd.f32 %v1683_v51, %v1594_v48 }
 0x25d   :  { %v1237_v12 = vpop.f32.mrf.mxu0  ;;  %v1326_v36 = vpop.f32.mrf.mxu1 }
 0x260   :  { %1968 = vmatmul.bf16.gmra.mxu0 %v3839_v9  ;;  %2057 = vmatmul.bf16.gmra.mxu1 %v3841_v10 }
 0x263   :  { %v1596_v43 = vpop.f32.mrf.mxu2  ;;  %v1685_v3 = vpop.f32.mrf.mxu3 }
 0x264   :  { %v4324_v22 = vadd.f32 %v1685_v3, %v1596_v43 }
 0x265   :  { %v1239_v7 = vpop.f32.mrf.mxu0  ;;  %v1328_v59 = vpop.f32.mrf.mxu1 }
 0x266   :  { %v1367_v18 = vpack.c.bf16 %v1239_v7, %v1237_v12  ;;  %v1368_v52 = vpack.c.bf16 %v1328_v59, %v1326_v36 }
 0x268   :  { %1638 = vmatmul.bf16.gmra.mxu2 %v1367_v18  ;;  %1727 = vmatmul.bf16.gmra.mxu3 %v1368_v52 }
 0x26b   :  { %v1599_v17 = vpop.f32.mrf.mxu2  ;;  %v1688_v58 = vpop.f32.mrf.mxu3 }
 0x26c   :  { %v4326_v50 = vadd.f32 %v1688_v58, %v1599_v17 }
 0x26d   :  { %v1242_v48 = vpop.f32.mrf.mxu0  ;;  %v1331_v51 = vpop.f32.mrf.mxu1 }
 0x270   :  { %1973 = vmatmul.bf16.gmra.mxu0 %v3873_v35  ;;  %2062 = vmatmul.bf16.gmra.mxu1 %v3876_v40 }
 0x273   :  { %v1601_v9 = vpop.f32.mrf.mxu2  ;;  %v1690_v10 = vpop.f32.mrf.mxu3 }
 0x274   :  { %v4330_v43 = vadd.f32 %v1690_v10, %v1601_v9 }
 0x275   :  { %v1244_v3 = vpop.f32.mrf.mxu0  ;;  %v1333_v7 = vpop.f32.mrf.mxu1 }
 0x276   :  { %v1369_v12 = vpack.c.bf16 %v1244_v3, %v1242_v48  ;;  %v1370_v36 = vpack.c.bf16 %v1333_v7, %v1331_v51 }
 0x278   :  { %1643 = vmatmul.bf16.gmra.mxu2 %v1369_v12  ;;  %1732 = vmatmul.bf16.gmra.mxu3 %v1370_v36 }
 0x27b   :  { %v1604_v18 = vpop.f32.mrf.mxu2  ;;  %v1693_v59 = vpop.f32.mrf.mxu3 }
 0x27c   :  { %v4332_v52 = vadd.f32 %v1693_v59, %v1604_v18 }
 0x27d   :  { %v1247_v17 = vpop.f32.mrf.mxu0  ;;  %v1336_v58 = vpop.f32.mrf.mxu1 }
 0x27e   :  { %4718 = vst [vmem:[#allocation42_spill] sm:$0xff] %v4332_v52 }
 0x280   :  { %1978 = vmatmul.bf16.gmra.mxu0 %v3905_v20  ;;  %2067 = vmatmul.bf16.gmra.mxu1 %v3908_v25 }
 0x283   :  { %v1606_v35 = vpop.f32.mrf.mxu2  ;;  %v1695_v40 = vpop.f32.mrf.mxu3 }
 0x284   :  { %v4336_v9 = vadd.f32 %v1695_v40, %v1606_v35 }
 0x285   :  { %v1249_v10 = vpop.f32.mrf.mxu0  ;;  %v1338_v3 = vpop.f32.mrf.mxu1 }
 0x286   :  { %v1371_v48 = vpack.c.bf16 %v1249_v10, %v1247_v17  ;;  %v1372_v51 = vpack.c.bf16 %v1338_v3, %v1336_v58 }
 0x288   :  { %1648 = vmatmul.bf16.gmra.mxu2 %v1371_v48  ;;  %1737 = vmatmul.bf16.gmra.mxu3 %v1372_v51 }
 0x28b   :  { %v1609_v12 = vpop.f32.mrf.mxu2  ;;  %v1698_v7 = vpop.f32.mrf.mxu3 }
 0x28c   :  { %v4338_v36 = vadd.f32 %v1698_v7, %v1609_v12 }
 0x28d   :  { %v1944_v18 = vpop.f32.mrf.mxu0  ;;  %v2033_v20 = vpop.f32.mrf.mxu1 }
 0x28e   :  { %v1945_v59 = vadd.f32 %v1944_v18, %v4284_v28 }
 0x290   :  { %v4341_v52 = vadd.f32 %v2033_v20, %v1945_v59  ;;  %1983 = vmatmul.bf16.gmra.mxu0 %v3935_v13  ;;  %2072 = vmatmul.bf16.gmra.mxu1 %v3938_v15 }
 0x293   :  { %v1611_v25 = vpop.f32.mrf.mxu2  ;;  %v1700_v17 = vpop.f32.mrf.mxu3 }
 0x294   :  { %v4345_v35 = vadd.f32 %v1700_v17, %v1611_v25 }
 0x295   :  { %v1946_v58 = vpop.f32.mrf.mxu0  ;;  %v2035_v10 = vpop.f32.mrf.mxu1 }
 0x296   :  { %v1947_v40 = vadd.f32 %v1946_v58, %v4288_v49 }
 0x298   :  { %v4348_v48 = vadd.f32 %v2035_v10, %v1947_v40  ;;  %2121 = vmatmul.bf16.vlgmr.msra.gmra.mxu2 %v3889_v56  ;;  %2210 = vmatmul.bf16.vlgmr.msra.gmra.mxu3 %v3893_v61 }
 0x29b   :  { %v1614_v28 = vpop.f32.mrf.mxu2  ;;  %v1703_v3 = vpop.f32.mrf.mxu3 }
 0x29c   :  { %v4352_v51 = vadd.f32 %v1703_v3, %v1614_v28 }
 0x29d   :  { %v1949_v13 = vpop.f32.mrf.mxu0  ;;  %v2038_v12 = vpop.f32.mrf.mxu1 }
 0x29e   :  { %v1950_v15 = vadd.f32 %v1949_v13, %v4290_v47 }
 0x2a0   :  { %v4355_v7 = vadd.f32 %v2038_v12, %v1950_v15  ;;  %1988 = vmatmul.bf16.gmra.mxu0 %v3959_v38  ;;  %2077 = vmatmul.bf16.gmra.mxu1 %v3962_v14 }
 0x2a3   :  { %v1616_v49 = vpop.f32.mrf.mxu2  ;;  %v1705_v18 = vpop.f32.mrf.mxu3 }
 0x2a4   :  { %v4359_v59 = vadd.f32 %v1705_v18, %v1616_v49 }
 0x2a5   :  { %v1951_v56 = vpop.f32.mrf.mxu0  ;;  %v2040_v20 = vpop.f32.mrf.mxu1 }
 0x2a6   :  { %v1952_v61 = vadd.f32 %v1951_v56, %v4294_v60 }
 0x2a8   :  { %v4362_v25 = vadd.f32 %v2040_v20, %v1952_v61  ;;  %2126 = vmatmul.bf16.gmra.mxu2 %v3918_v46  ;;  %2215 = vmatmul.bf16.gmra.mxu3 %v3922_v27 }
 0x2ab   :  { %v1619_v47 = vpop.f32.mrf.mxu2  ;;  %v1708_v17 = vpop.f32.mrf.mxu3 }
 0x2ac   :  { %v4366_v58 = vadd.f32 %v1708_v17, %v1619_v47 }
 0x2ad   :  { %v1954_v38 = vpop.f32.mrf.mxu0  ;;  %v2043_v40 = vpop.f32.mrf.mxu1 }
 0x2ae   :  { %v1955_v14 = vadd.f32 %v1954_v38, %v4302_v57 }
 0x2b0   :  { %v4369_v10 = vadd.f32 %v2043_v40, %v1955_v14  ;;  %1993 = vmatmul.bf16.gmra.mxu0 %v3992_v11  ;;  %2082 = vmatmul.bf16.gmra.mxu1 %v3994_v21  ;;  %v576_v40 = vadd.f32 %v4000_v30, %v3865_v32  ;;  %v490_v30 = vadd.f32 %v4009_v54, %v3859_v16 }
 0x2b3   :  { %v1621_v60 = vpop.f32.mrf.mxu2  ;;  %v1710_v28 = vpop.f32.mrf.mxu3 }
 0x2b4   :  { %v4373_v3 = vadd.f32 %v1710_v28, %v1621_v60  ;;  %v672_v28 = vmax.f32 %v576_v40, 0.0  ;;  %v4722_v40 = vld [vmem:[#allocation4_spill] sm:$0xff] }
 0x2b5   :  { %v1956_v46 = vpop.f32.mrf.mxu0  ;;  %v2045_v13 = vpop.f32.mrf.mxu1 }
 0x2b6   :  { %v1957_v27 = vadd.f32 %v1956_v46, %v4306_v37 }
 0x2b8   :  { %v4376_v15 = vadd.f32 %v2045_v13, %v1957_v27  ;;  %2131 = vmatmul.bf16.gmra.mxu2 %v3948_v44  ;;  %2220 = vmatmul.bf16.gmra.mxu3 %v3952_v45 }
 0x2bb   :  { %v1624_v57 = vpop.f32.mrf.mxu2  ;;  %v1713_v12 = vpop.f32.mrf.mxu3 }
 0x2bc   :  { %v4380_v49 = vadd.f32 %v1713_v12, %v1624_v57 }
 0x2bd   :  { %v1959_v11 = vpop.f32.mrf.mxu0  ;;  %v2048_v18 = vpop.f32.mrf.mxu1 }
 0x2be   :  { %v1960_v21 = vadd.f32 %v1959_v11, %v4308_v2  ;;  %v4719_v11 = vld [vmem:[#allocation3_spill] sm:$0xff] }
 0x2c0   :  { %v4383_v56 = vadd.f32 %v2048_v18, %v1960_v21  ;;  %1998 = vmatmul.bf16.gmra.mxu0 %v4016_v6  ;;  %2087 = vmatmul.bf16.gmra.mxu1 %v4018_v8  ;;  %v485_v6 = vadd.f32 %v3979_v29, %v3859_v16  ;;  %v487_v8 = vadd.f32 %v3998_v24, %v3859_v16  ;;  %v4720_v18 = vld [vmem:[#allocation10_spill] sm:$0xff] }
 0x2c1   :  { %v581_v21 = vadd.f32 %v4719_v11, %v3865_v32 }
 0x2c3   :  { %v1626_v37 = vpop.f32.mrf.mxu2  ;;  %v1715_v61 = vpop.f32.mrf.mxu3 }
 0x2c4   :  { %v4387_v20 = vadd.f32 %v1715_v61, %v1626_v37  ;;  %v4721_v37 = vld [vmem:[#allocation11_spill] sm:$0xff]  ;;  %v675_v61 = vmax.f32 %v490_v30, 0.0 }
 0x2c5   :  { %v1961_v44 = vpop.f32.mrf.mxu0  ;;  %v2050_v47 = vpop.f32.mrf.mxu1 }
 0x2c6   :  { %v1962_v45 = vadd.f32 %v1961_v44, %v4312_v0  ;;  %v574_v0 = vadd.f32 %v3983_v63, %v3865_v32 }
 0x2c8   :  { %v4390_v17 = vadd.f32 %v2050_v47, %v1962_v45  ;;  %2136 = vmatmul.bf16.gmra.mxu2 %v3972_v39  ;;  %2225 = vmatmul.bf16.gmra.mxu3 %v3976_v42  ;;  %v667_v39 = vmax.f32 %v485_v6, 0.0  ;;  %v671_v42 = vmax.f32 %v487_v8, 0.0  ;;  %v668_v60 = vmax.f32 %v574_v0, 0.0 }
 0x2c9   :  { %v680_v47 = vmax.f32 %v581_v21, 0.0 }
 0x2ca   :  { %v779_v13 = vpack.c.bf16 %v671_v42, %v667_v39  ;;  %v780_v24 = vpack.c.bf16 %v672_v28, %v668_v60  ;;  %v495_v39 = vadd.f32 %v4722_v40, %v3859_v16  ;;  %v4723_v42 = vld [vmem:[#allocation6_spill] sm:$0xff]  ;;  %v4724_v28 = vld [vmem:[#allocation5_spill] sm:$0xff] }
 0x2cb   :  { %v1629_v2 = vpop.f32.mrf.mxu2  ;;  %v1718_v38 = vpop.f32.mrf.mxu3  ;;  %v497_v60 = vadd.f32 %v4723_v42, %v3859_v16  ;;  %v4731_v40 = vld [vmem:[#allocation13_spill] sm:$0xff] }
 0x2cc   :  { %v4394_v14 = vadd.f32 %v1718_v38, %v1629_v2 }
 0x2cd   :  { %v687_v30 = vmax.f32 %v497_v60, 0.0 }
 0x2d0   :  { %2003 = vmatmul.bf16.gmra.mxu0 %v4046_v41  ;;  %2092 = vmatmul.bf16.gmra.mxu1 %v4048_v62  ;;  %v492_v62 = vadd.f32 %v4022_v4, %v3859_v16  ;;  %v579_v41 = vadd.f32 %v4013_v55, %v3865_v32 }
 0x2d2   :  { %v679_v44 = vmax.f32 %v492_v62, 0.0  ;;  %v676_v45 = vmax.f32 %v579_v41, 0.0 }
 0x2d3   :  { %v1631_v46 = vpop.f32.mrf.mxu2  ;;  %v1720_v27 = vpop.f32.mrf.mxu3 }
 0x2d4   :  { %v4406_v29 = vadd.f32 %v1720_v27, %v1631_v46  ;;  %v783_v6 = vpack.c.bf16 %v679_v44, %v675_v61  ;;  %v784_v4 = vpack.c.bf16 %v680_v47, %v676_v45  ;;  %v584_v46 = vadd.f32 %v4724_v28, %v3865_v32  ;;  %v4725_v27 = vld [vmem:[#allocation7_spill] sm:$0xff] }
 0x2d6   :  { %v684_v62 = vmax.f32 %v584_v46, 0.0 }
 0x2d8   :  { %2141 = vmatmul.bf16.gmra.mxu2 %v779_v13  ;;  %2230 = vmatmul.bf16.gmra.mxu3 %v780_v24  ;;  %v586_v13 = vadd.f32 %v4725_v27, %v3865_v32  ;;  %v4726_v24 = vld [vmem:[#allocation14_spill] sm:$0xff] }
 0x2da   :  { %v688_v41 = vmax.f32 %v586_v13, 0.0 }
 0x2db   :  { %v1634_v63 = vpop.f32.mrf.mxu2  ;;  %v1723_v57 = vpop.f32.mrf.mxu3 }
 0x2dc   :  { %v4408_v12 = vadd.f32 %v1723_v57, %v1634_v63  ;;  %v4727_v63 = vld [vmem:[#allocation15_spill] sm:$0xff]  ;;  %v683_v57 = vmax.f32 %v495_v39, 0.0  ;;  %v788_v61 = vpack.c.bf16 %v688_v41, %v684_v62  ;;  %v591_v39 = vadd.f32 %v4731_v40, %v3865_v32 }
 0x2de   :  { %v696_v46 = vmax.f32 %v591_v39, 0.0 }
 0x2e0   :  { %2008 = vmatmul.bf16.gmra.mxu0 %v4720_v18  ;;  %2097 = vmatmul.bf16.gmra.mxu1 %v4721_v37  ;;  %v787_v37 = vpack.c.bf16 %v687_v30, %v683_v57 }
 0x2e3   :  { %v1636_v2 = vpop.f32.mrf.mxu2  ;;  %v1725_v38 = vpop.f32.mrf.mxu3 }
 0x2e4   :  { %v4420_v54 = vadd.f32 %v1725_v38, %v1636_v2  ;;  %v4728_v2 = vld [vmem:[#allocation8_spill] sm:$0xff] }
 0x2e5   :  { %v500_v38 = vadd.f32 %v4728_v2, %v3859_v16 }
 0x2e7   :  { %v691_v42 = vmax.f32 %v500_v38, 0.0 }
 0x2e8   :  { %2146 = vmatmul.bf16.gmra.mxu2 %v783_v6  ;;  %2235 = vmatmul.bf16.gmra.mxu3 %v784_v4  ;;  %v4729_v6 = vld [vmem:[#allocation12_spill] sm:$0xff] }
 0x2e9   :  { %v502_v4 = vadd.f32 %v4729_v6, %v3859_v16 }
 0x2eb   :  { %v1639_v55 = vpop.f32.mrf.mxu2  ;;  %v1728_v8 = vpop.f32.mrf.mxu3  ;;  %v695_v60 = vmax.f32 %v502_v4, 0.0 }
 0x2ec   :  { %v4422_v0 = vadd.f32 %v1728_v8, %v1639_v55  ;;  %v4730_v55 = vld [vmem:[#allocation9_spill] sm:$0xff] }
 0x2ed   :  { %v589_v8 = vadd.f32 %v4730_v55, %v3865_v32 }
 0x2ef   :  { %v692_v28 = vmax.f32 %v589_v8, 0.0 }
 0x2f0   :  { %2013 = vmatmul.bf16.gmra.mxu0 %v4726_v24  ;;  %2102 = vmatmul.bf16.gmra.mxu1 %v4727_v63  ;;  %v791_v63 = vpack.c.bf16 %v695_v60, %v691_v42  ;;  %v510_v60 = vadd.f32 %v4126_v34, %v3859_v16 }
 0x2f1   :  { %v792_v57 = vpack.c.bf16 %v696_v46, %v692_v28  ;;  %v4734_v28 = vld [vmem:[#allocation19_spill] sm:$0xff] }
 0x2f2   :  { %v512_v46 = vadd.f32 %v4734_v28, %v3859_v16 }
 0x2f3   :  { %v1641_v11 = vpop.f32.mrf.mxu2  ;;  %v1730_v21 = vpop.f32.mrf.mxu3 }
 0x2f4   :  { %v4434_v18 = vadd.f32 %v1730_v21, %v1641_v11  ;;  %v4733_v21 = vld [vmem:[#allocation17_spill] sm:$0xff] }
 0x2f8   :  { %2151 = vmatmul.bf16.gmra.mxu2 %v787_v37  ;;  %2240 = vmatmul.bf16.gmra.mxu3 %v788_v61  ;;  %v594_v37 = vadd.f32 %v4733_v21, %v3865_v32  ;;  %v596_v61 = vadd.f32 %v4116_v23, %v3865_v32  ;;  %v4466_v23 = vld [vmem:[%s4672_s6] ss:$0 sm:$0xff] }
 0x2fa   :  { %v700_v2 = vmax.f32 %v594_v37, 0.0  ;;  %v704_v38 = vmax.f32 %v596_v61, 0.0 }
 0x2fb   :  { %v1644_v44 = vpop.f32.mrf.mxu2  ;;  %v1733_v45 = vpop.f32.mrf.mxu3 }
 0x2fc   :  { %v4436_v47 = vadd.f32 %v1733_v45, %v1644_v44  ;;  %v796_v40 = vpack.c.bf16 %v704_v38, %v700_v2 }
 0x300   :  { %2018 = vmatmul.bf16.gmra.mxu0 %v4118_v19  ;;  %2107 = vmatmul.bf16.gmra.mxu1 %v4120_v26  ;;  %v4732_v19 = vld [vmem:[#allocation16_spill] sm:$0xff]  ;;  %v507_v26 = vadd.f32 %v4114_v1, %v3859_v16 }
 0x301   :  { %v505_v11 = vadd.f32 %v4732_v19, %v3859_v16  ;;  %v711_v19 = vmax.f32 %v512_v46, 0.0 }
 0x302   :  { %v703_v45 = vmax.f32 %v507_v26, 0.0 }
 0x303   :  { %v1646_v27 = vpop.f32.mrf.mxu2  ;;  %v1735_v13 = vpop.f32.mrf.mxu3  ;;  %v699_v44 = vmax.f32 %v505_v11, 0.0 }
 0x304   :  { %v4448_v24 = vadd.f32 %v1735_v13, %v1646_v27  ;;  %v4735_v13 = vld [vmem:[#allocation18_spill] sm:$0xff] }
 0x305   :  { %v795_v8 = vpack.c.bf16 %v703_v45, %v699_v44  ;;  %v4478_v44 = vpop.f32.mrf.mxu0 }
 0x308   :  { %2156 = vmatmul.bf16.gmra.mxu2 %v791_v63  ;;  %2245 = vmatmul.bf16.gmra.mxu3 %v792_v57  ;;  %v599_v63 = vadd.f32 %v4735_v13, %v3865_v32  ;;  %v4736_v57 = vld [vmem:[#allocation20_spill] sm:$0xff] }
 0x30a   :  { %v708_v26 = vmax.f32 %v599_v63, 0.0  ;;  %v4740_v63 = vld [vmem:[#allocation24_spill] sm:$0xff] }
 0x30b   :  { %v1649_v30 = vpop.f32.mrf.mxu2  ;;  %v1738_v62 = vpop.f32.mrf.mxu3 }
 0x30c   :  { %v4450_v41 = vadd.f32 %v1738_v62, %v1649_v30  ;;  %v601_v30 = vadd.f32 %v4736_v57, %v3865_v32  ;;  %v707_v62 = vmax.f32 %v510_v60, 0.0  ;;  %v4738_v60 = vld [vmem:[#allocation23_spill] sm:$0xff]  ;;  %v606_v57 = vadd.f32 %v4740_v63, %v3865_v32 }
 0x30d   :  { %v517_v28 = vadd.f32 %v4738_v60, %v3859_v16  ;;  %v522_v60 = vadd.f32 %v4182_v53, %v3859_v16 }
 0x30e   :  { %v712_v21 = vmax.f32 %v601_v30, 0.0  ;;  %v799_v2 = vpack.c.bf16 %v711_v19, %v707_v62  ;;  %v4492_v30 = vpop.f32.mrf.mxu0 }
 0x30f   :  { %v719_v62 = vmax.f32 %v517_v28, 0.0 }
 0x310   :  { %v800_v38 = vpack.c.bf16 %v712_v21, %v708_v26  ;;  %v720_v26 = vmax.f32 %v606_v57, 0.0 }
 0x313   :  { %v1651_v6 = vpop.f32.mrf.mxu2  ;;  %v1740_v4 = vpop.f32.mrf.mxu3 }
 0x314   :  { %v4460_v55 = vadd.f32 %v1740_v4, %v1651_v6 }
 0x318   :  { %2161 = vmatmul.bf16.gmra.mxu2 %v795_v8  ;;  %2250 = vmatmul.bf16.gmra.mxu3 %v796_v40  ;;  %v4481_v8 = vpop.f32.mrf.mxu1 }
 0x31b   :  { %v2122_v39 = vpop.f32.mrf.mxu2  ;;  %v2211_v42 = vpop.f32.mrf.mxu3 }
 0x31c   :  { %v2123_v1 = vadd.f32 %v2122_v39, %v4341_v52 }
 0x31e   :  { %v2212_v27 = vadd.f32 %v2211_v42, %v2123_v1 }
 0x320   :  { %v2295_v52 = vadd.f32 %v4466_v23, %v2212_v27  ;;  %v4739_v27 = vld [vmem:[#allocation22_spill] sm:$0xff] }
 0x321   :  { %v604_v13 = vadd.f32 %v4739_v27, %v3865_v32 }
 0x322   :  { %v2327_v11 = vmax.f32 %v2295_v52, 0.0 }
 0x323   :  { %v2124_v37 = vpop.f32.mrf.mxu2  ;;  %v2213_v61 = vpop.f32.mrf.mxu3 }
 0x324   :  { %v2125_v34 = vadd.f32 %v2124_v37, %v4348_v48  ;;  %2359 = vxpose.xlu2.b32.start [1/16] %v2327_v11, 128  ;;  %v4737_v48 = vld [vmem:[#allocation21_spill] sm:$0xff]  ;;  %v716_v11 = vmax.f32 %v604_v13, 0.0  ;;  %v4743_v13 = vld [vmem:[#allocation27_spill] sm:$0xff] }
 0x325   :  { %v515_v42 = vadd.f32 %v4737_v48, %v3859_v16  ;;  %v611_v63 = vadd.f32 %v4743_v13, %v3865_v32 }
 0x326   :  { %v2214_v45 = vadd.f32 %v2213_v61, %v2125_v34  ;;  %v4496_v61 = vpop.f32.mrf.mxu1 }
 0x328   :  { %v2296_v6 = vadd.f32 %v4466_v23, %v2214_v45  ;;  %2166 = vmatmul.bf16.gmra.mxu2 %v799_v2  ;;  %2255 = vmatmul.bf16.gmra.mxu3 %v800_v38  ;;  %v804_v38 = vpack.c.bf16 %v720_v26, %v716_v11  ;;  %v728_v11 = vmax.f32 %v611_v63, 0.0  ;;  %v4747_v63 = vld [vmem:[#allocation31_spill] sm:$0xff] }
 0x32a   :  { %v2328_v4 = vmax.f32 %v2296_v6, 0.0 }
 0x32b   :  { %v2127_v40 = vpop.f32.mrf.mxu2  ;;  %v2216_v1 = vpop.f32.mrf.mxu3 }
 0x32c   :  { %v2128_v39 = vadd.f32 %v2127_v40, %v4355_v7  ;;  %2360 = vxpose.xlu2.b32.cont [2/16] %v2328_v4, 128  ;;  %v715_v7 = vmax.f32 %v515_v42, 0.0  ;;  %v4499_v4 = vpop.f32.mrf.mxu0 }
 0x32e   :  { %v2217_v46 = vadd.f32 %v2216_v1, %v2128_v39  ;;  %v803_v2 = vpack.c.bf16 %v719_v62, %v715_v7  ;;  %v4510_v57 = vpop.f32.mrf.mxu1  ;;  %v727_v7 = vmax.f32 %v522_v60, 0.0  ;;  %v4745_v60 = vld [vmem:[#allocation30_spill] sm:$0xff] }
 0x330   :  { %v2297_v52 = vadd.f32 %v4466_v23, %v2217_v46  ;;  %v4742_v46 = vld [vmem:[#allocation26_spill] sm:$0xff] }
 0x331   :  { %v609_v27 = vadd.f32 %v4742_v46, %v3865_v32 }
 0x332   :  { %v2329_v19 = vmax.f32 %v2297_v52, 0.0 }
 0x333   :  { %v2129_v21 = vpop.f32.mrf.mxu2  ;;  %v2218_v34 = vpop.f32.mrf.mxu3 }
 0x334   :  { %v2130_v37 = vadd.f32 %v2129_v21, %v4362_v25  ;;  %2361 = vxpose.xlu2.b32.cont [3/16] %v2329_v19, 128  ;;  %v4741_v25 = vld [vmem:[#allocation25_spill] sm:$0xff]  ;;  %v724_v19 = vmax.f32 %v609_v27, 0.0  ;;  %v4513_v26 = vpop.f32.mrf.mxu0 }
 0x335   :  { %v520_v42 = vadd.f32 %v4741_v25, %v3859_v16  ;;  %v4746_v27 = vld [vmem:[#allocation29_spill] sm:$0xff] }
 0x336   :  { %v2219_v45 = vadd.f32 %v2218_v34, %v2130_v37  ;;  %v614_v13 = vadd.f32 %v4746_v27, %v3865_v32  ;;  %v1967_v27 = vadd.f32 %v4492_v30, %v4324_v22 }
 0x338   :  { %v2298_v6 = vadd.f32 %v4466_v23, %v2219_v45  ;;  %2171 = vmatmul.bf16.gmra.mxu2 %v803_v2  ;;  %2260 = vmatmul.bf16.gmra.mxu3 %v804_v38  ;;  %v808_v2 = vpack.c.bf16 %v728_v11, %v724_v19  ;;  %v732_v19 = vmax.f32 %v614_v13, 0.0 }
 0x33a   :  { %v2330_v40 = vmax.f32 %v2298_v6, 0.0  ;;  %v4517_v6 = vpop.f32.mrf.mxu1 }
 0x33b   :  { %v2132_v39 = vpop.f32.mrf.mxu2  ;;  %v2221_v48 = vpop.f32.mrf.mxu3 }
 0x33c   :  { %v2133_v1 = vadd.f32 %v2132_v39, %v4369_v10  ;;  %2362 = vxpose.xlu2.b32.cont [4/16] %v2330_v40, 128  ;;  %v723_v10 = vmax.f32 %v520_v42, 0.0  ;;  %v4520_v25 = vpop.f32.mrf.mxu0 }
 0x33e   :  { %v2222_v28 = vadd.f32 %v2221_v48, %v2133_v1  ;;  %v807_v45 = vpack.c.bf16 %v727_v7, %v723_v10 }
 0x340   :  { %v2299_v52 = vadd.f32 %v4466_v23, %v2222_v28  ;;  %v527_v28 = vadd.f32 %v4745_v60, %v3859_v16 }
 0x342   :  { %v2331_v62 = vmax.f32 %v2299_v52, 0.0  ;;  %v616_v52 = vadd.f32 %v4747_v63, %v3865_v32  ;;  %v735_v7 = vmax.f32 %v527_v28, 0.0  ;;  %v4749_v63 = vld [vmem:[#allocation33_spill] sm:$0xff] }
 0x343   :  { %v2134_v21 = vpop.f32.mrf.mxu2  ;;  %v2223_v37 = vpop.f32.mrf.mxu3 }
 0x344   :  { %v2135_v53 = vadd.f32 %v2134_v21, %v4376_v15  ;;  %2363 = vxpose.xlu2.b32.cont [5/16] %v2331_v62, 128  ;;  %v4744_v15 = vld [vmem:[#allocation28_spill] sm:$0xff]  ;;  %v736_v11 = vmax.f32 %v616_v52, 0.0  ;;  %v4531_v21 = vpop.f32.mrf.mxu1  ;;  %v4750_v52 = vld [vmem:[#allocation34_spill] sm:$0xff] }
 0x345   :  { %v525_v42 = vadd.f32 %v4744_v15, %v3859_v16 }
 0x346   :  { %v2224_v34 = vadd.f32 %v2223_v37, %v2135_v53 }
 0x348   :  { %v2300_v38 = vadd.f32 %v4466_v23, %v2224_v34  ;;  %2176 = vmatmul.bf16.gmra.mxu2 %v807_v45  ;;  %2265 = vmatmul.bf16.gmra.mxu3 %v808_v2  ;;  %v1965_v45 = vadd.f32 %v4478_v44, %v4320_v31  ;;  %v4748_v31 = vld [vmem:[#allocation32_spill] sm:$0xff] }
 0x349   :  { %v530_v44 = vadd.f32 %v4748_v31, %v3859_v16 }
 0x34a   :  { %v2332_v40 = vmax.f32 %v2300_v38, 0.0 }
 0x34b   :  { %v2137_v39 = vpop.f32.mrf.mxu2  ;;  %v2226_v48 = vpop.f32.mrf.mxu3 }
 0x34c   :  { %v2138_v1 = vadd.f32 %v2137_v39, %v4383_v56  ;;  %2364 = vxpose.xlu2.b32.cont [6/16] %v2332_v40, 128  ;;  %v731_v56 = vmax.f32 %v525_v42, 0.0  ;;  %v4536_v40 = vpop.f32.mrf.mxu0  ;;  %v812_v39 = vpack.c.bf16 %v736_v11, %v732_v19  ;;  %v4540_v28 = vpop.f32.mrf.mxu1  ;;  %v2056_v11 = vadd.f32 %v4496_v61, %v1967_v27 }
 0x34e   :  { %v2227_v46 = vadd.f32 %v2226_v48, %v2138_v1  ;;  %v811_v38 = vpack.c.bf16 %v735_v7, %v731_v56  ;;  %v2054_v48 = vadd.f32 %v4481_v8, %v1965_v45  ;;  %v619_v8 = vadd.f32 %v4749_v63, %v3865_v32  ;;  %v4753_v63 = vld [vmem:[#allocation37_spill] sm:$0xff] }
 0x34f   :  { %v1970_v45 = vadd.f32 %v4499_v4, %v4326_v50  ;;  %v535_v50 = vadd.f32 %v4250_v33, %v3859_v16  ;;  %v4751_v4 = vld [vmem:[#allocation36_spill] sm:$0xff] }
 0x350   :  { %v2301_v10 = vadd.f32 %v4466_v23, %v2227_v46  ;;  %v532_v46 = vadd.f32 %v4236_v5, %v3859_v16  ;;  %v740_v5 = vmax.f32 %v619_v8, 0.0  ;;  %v626_v8 = vadd.f32 %v4753_v63, %v3865_v32 }
 0x351   :  { %v2059_v61 = vadd.f32 %v4510_v57, %v1970_v45 }
 0x352   :  { %v2333_v62 = vmax.f32 %v2301_v10, 0.0  ;;  %v621_v10 = vadd.f32 %v4750_v52, %v3865_v32  ;;  %v743_v19 = vmax.f32 %v532_v46, 0.0  ;;  %v1972_v46 = vadd.f32 %v4513_v26, %v4330_v43 }
 0x353   :  { %v2139_v53 = vpop.f32.mrf.mxu2  ;;  %v2228_v34 = vpop.f32.mrf.mxu3 }
 0x354   :  { %v2140_v37 = vadd.f32 %v2139_v53, %v4390_v17  ;;  %2365 = vxpose.xlu2.b32.cont [7/16] %v2333_v62, 128  ;;  %v4553_v7 = vpop.f32.mrf.mxu0  ;;  %v739_v62 = vmax.f32 %v530_v44, 0.0  ;;  %v537_v44 = vadd.f32 %v4751_v4, %v3859_v16  ;;  %v2061_v33 = vadd.f32 %v4517_v6, %v1972_v46  ;;  %v4757_v46 = vld [vmem:[#allocation39_spill] sm:$0xff] }
 0x355   :  { %v1977_v4 = vadd.f32 %v4536_v40, %v4336_v9 }
 0x356   :  { %v2229_v2 = vadd.f32 %v2228_v34, %v2140_v37  ;;  %v744_v37 = vmax.f32 %v621_v10, 0.0 }
 0x358   :  { %v2302_v1 = vadd.f32 %v4466_v23, %v2229_v2  ;;  %2181 = vmatmul.bf16.gmra.mxu2 %v811_v38  ;;  %2270 = vmatmul.bf16.gmra.mxu3 %v812_v39  ;;  %v815_v38 = vpack.c.bf16 %v743_v19, %v739_v62  ;;  %v4558_v39 = vpop.f32.mrf.mxu1  ;;  %v751_v62 = vmax.f32 %v537_v44, 0.0 }
 0x35a   :  { %v2334_v15 = vmax.f32 %v2302_v1, 0.0  ;;  %v816_v1 = vpack.c.bf16 %v744_v37, %v740_v5 }
 0x35b   :  { %v2142_v42 = vpop.f32.mrf.mxu2  ;;  %v2231_v17 = vpop.f32.mrf.mxu3 }
 0x35c   :  { %v2143_v60 = vadd.f32 %v2142_v42, %v2054_v48  ;;  %2366 = vxpose.xlu2.b32.cont [8/16] %v2334_v15, 128  ;;  %v4562_v42 = vpop.f32.mrf.mxu0 }
 0x35e   :  { %v2232_v13 = vadd.f32 %v2231_v17, %v2143_v60 }
 0x360   :  { %v2303_v56 = vadd.f32 %v4466_v23, %v2232_v13  ;;  %v4752_v13 = vld [vmem:[#allocation35_spill] sm:$0xff]  ;;  %v4575_v10 = vpop.f32.mrf.mxu1 }
 0x361   :  { %v624_v57 = vadd.f32 %v4752_v13, %v3865_v32 }
 0x362   :  { %v2335_v53 = vmax.f32 %v2303_v56, 0.0  ;;  %v747_v56 = vmax.f32 %v535_v50, 0.0 }
 0x363   :  { %v2144_v34 = vpop.f32.mrf.mxu2  ;;  %v2233_v30 = vpop.f32.mrf.mxu3 }
 0x364   :  { %v2145_v22 = vadd.f32 %v2144_v34, %v2056_v11  ;;  %2367 = vxpose.xlu2.b32.cont [9/16] %v2335_v53, 128  ;;  %v748_v11 = vmax.f32 %v624_v57, 0.0  ;;  %v752_v53 = vmax.f32 %v626_v8, 0.0  ;;  %v1984_v37 = vpop.f32.mrf.mxu0  ;;  %v4754_v34 = vld [vmem:[#allocation42_spill] sm:$0xff]  ;;  %v819_v45 = vpack.c.bf16 %v751_v62, %v747_v56 }
 0x365   :  { %v2066_v56 = vadd.f32 %v4540_v28, %v1977_v4 }
 0x366   :  { %v2234_v2 = vadd.f32 %v2233_v30, %v2145_v22  ;;  %v1975_v22 = vadd.f32 %v4520_v25, %v4754_v34  ;;  %v4756_v25 = vld [vmem:[#allocation40_spill] sm:$0xff] }
 0x367   :  { %v542_v50 = vadd.f32 %v4756_v25, %v3859_v16 }
 0x368   :  { %v2304_v48 = vadd.f32 %v4466_v23, %v2234_v2  ;;  %2186 = vmatmul.bf16.gmra.mxu2 %v815_v38  ;;  %2275 = vmatmul.bf16.gmra.mxu3 %v816_v1  ;;  %v820_v2 = vpack.c.bf16 %v752_v53, %v748_v11  ;;  %v2064_v6 = vadd.f32 %v4531_v21, %v1975_v22  ;;  %v4758_v21 = vld [vmem:[#allocation41_spill] sm:$0xff] }
 0x369   :  { %v631_v13 = vadd.f32 %v4758_v21, %v3865_v32  ;;  %v1980_v53 = vadd.f32 %v4553_v7, %v4338_v36 }
 0x36a   :  { %v2336_v15 = vmax.f32 %v2304_v48, 0.0  ;;  %v2073_v48 = vpop.f32.mrf.mxu1 }
 0x36b   :  { %v2147_v60 = vpop.f32.mrf.mxu2  ;;  %v2236_v31 = vpop.f32.mrf.mxu3  ;;  %v2069_v28 = vadd.f32 %v4558_v39, %v1980_v53  ;;  %v1985_v39 = vadd.f32 %v1984_v37, %v4352_v51 }
 0x36c   :  { %v2148_v17 = vadd.f32 %v2147_v60, %v2059_v61  ;;  %2368 = vxpose.xlu2.b32.cont [10/16] %v2336_v15, 128  ;;  %v1986_v57 = vpop.f32.mrf.mxu0 }
 0x36e   :  { %v2237_v27 = vadd.f32 %v2236_v31, %v2148_v17  ;;  %v4755_v17 = vld [vmem:[#allocation38_spill] sm:$0xff] }
 0x36f   :  { %v540_v31 = vadd.f32 %v4755_v17, %v3859_v16  ;;  %v760_v16 = vmax.f32 %v631_v13, 0.0 }
 0x370   :  { %v2305_v52 = vadd.f32 %v4466_v23, %v2237_v27  ;;  %v629_v27 = vadd.f32 %v4757_v46, %v3865_v32 }
 0x371   :  { %v755_v8 = vmax.f32 %v540_v31, 0.0 }
 0x372   :  { %v2337_v19 = vmax.f32 %v2305_v52, 0.0  ;;  %v759_v52 = vmax.f32 %v542_v50, 0.0  ;;  %v2075_v40 = vpop.f32.mrf.mxu1 }
 0x373   :  { %v2149_v5 = vpop.f32.mrf.mxu2  ;;  %v2238_v26 = vpop.f32.mrf.mxu3 }
 0x374   :  { %v2150_v43 = vadd.f32 %v2149_v5, %v2061_v33  ;;  %2369 = vxpose.xlu2.b32.cont [11/16] %v2337_v19, 128  ;;  %v756_v33 = vmax.f32 %v629_v27, 0.0  ;;  %v823_v32 = vpack.c.bf16 %v759_v52, %v755_v8  ;;  %v1989_v34 = vpop.f32.mrf.mxu0 }
 0x376   :  { %v2239_v30 = vadd.f32 %v2238_v26, %v2150_v43  ;;  %v824_v43 = vpack.c.bf16 %v760_v16, %v756_v33 }
 0x378   :  { %v2306_v38 = vadd.f32 %v4466_v23, %v2239_v30  ;;  %2191 = vmatmul.bf16.gmra.mxu2 %v819_v45  ;;  %2280 = vmatmul.bf16.gmra.mxu3 %v820_v2 }
 0x37a   :  { %v2338_v1 = vmax.f32 %v2306_v38, 0.0  ;;  %v1982_v38 = vadd.f32 %v4562_v42, %v4345_v35  ;;  %v2078_v36 = vpop.f32.mrf.mxu1 }
 0x37b   :  { %v2152_v61 = vpop.f32.mrf.mxu2  ;;  %v2241_v60 = vpop.f32.mrf.mxu3 }
 0x37c   :  { %v2153_v15 = vadd.f32 %v2152_v61, %v2064_v6  ;;  %2370 = vxpose.xlu2.b32.cont [12/16] %v2338_v1, 128  ;;  %v2071_v1 = vadd.f32 %v4575_v10, %v1982_v38  ;;  %v1987_v10 = vadd.f32 %v1986_v57, %v4359_v59 }
 0x37e   :  { %v2242_v44 = vadd.f32 %v2241_v60, %v2153_v15  ;;  %v1991_v15 = vpop.f32.mrf.mxu0  ;;  %v2076_v8 = vadd.f32 %v2075_v40, %v1987_v10 }
 0x37f   :  { %v1992_v40 = vadd.f32 %v1991_v15, %v4373_v3 }
 0x380   :  { %v2307_v63 = vadd.f32 %v4466_v23, %v2242_v44  ;;  %v2074_v44 = vadd.f32 %v2073_v48, %v1985_v39  ;;  %v1990_v48 = vadd.f32 %v1989_v34, %v4366_v58 }
 0x382   :  { %v2339_v62 = vmax.f32 %v2307_v63, 0.0  ;;  %v2080_v4 = vpop.f32.mrf.mxu1 }
 0x383   :  { %v2154_v19 = vpop.f32.mrf.mxu2  ;;  %v2243_v9 = vpop.f32.mrf.mxu3 }
 0x384   :  { %v2155_v11 = vadd.f32 %v2154_v19, %v2066_v56  ;;  %2371 = vxpose.xlu2.b32.cont [13/16] %v2339_v62, 128 }
 0x386   :  { %v2244_v5 = vadd.f32 %v2243_v9, %v2155_v11  ;;  %v1994_v21 = vpop.f32.mrf.mxu0  ;;  %v2079_v11 = vadd.f32 %v2078_v36, %v1990_v48 }
 0x388   :  { %v2308_v26 = vadd.f32 %v4466_v23, %v2244_v5  ;;  %2196 = vmatmul.bf16.gmra.mxu2 %v823_v32  ;;  %2285 = vmatmul.bf16.gmra.mxu3 %v824_v43 }
 0x38a   :  { %v2340_v22 = vmax.f32 %v2308_v26, 0.0  ;;  %v2083_v56 = vpop.f32.mrf.mxu1 }
 0x38b   :  { %v2157_v30 = vpop.f32.mrf.mxu2  ;;  %v2246_v2 = vpop.f32.mrf.mxu3 }
 0x38c   :  { %v2158_v45 = vadd.f32 %v2157_v30, %v2069_v28  ;;  %2372 = vxpose.xlu2.b32.cont [14/16] %v2340_v22, 128  ;;  %v2081_v28 = vadd.f32 %v2080_v4, %v1992_v40 }
 0x38e   :  { %v2247_v6 = vadd.f32 %v2246_v2, %v2158_v45  ;;  %v1996_v16 = vpop.f32.mrf.mxu0  ;;  %v4610_v45 = vpop.permute.xlu1 %2441  ;;  %v1995_v2 = vadd.f32 %v1994_v21, %v4380_v49 }
 0x390   :  { %v2309_v7 = vadd.f32 %v4466_v23, %v2247_v6 }
 0x392   :  { %v2341_v61 = vmax.f32 %v2309_v7, 0.0  ;;  %v2085_v5 = vpop.f32.mrf.mxu1  ;;  %v2084_v7 = vadd.f32 %v2083_v56, %v1995_v2 }
 0x393   :  { %v2159_v60 = vpop.f32.mrf.mxu2  ;;  %v2248_v31 = vpop.f32.mrf.mxu3 }
 0x394   :  { %v2160_v17 = vadd.f32 %v2159_v60, %v2071_v1  ;;  %2373 = vxpose.xlu2.b32.cont [15/16] %v2341_v61, 128 }
 0x396   :  { %v2249_v25 = vadd.f32 %v2248_v31, %v2160_v17  ;;  %v1999_v26 = vpop.f32.mrf.mxu0  ;;  %v1997_v31 = vadd.f32 %v1996_v16, %v4387_v20 }
 0x397   :  { %v2000_v10 = vadd.f32 %v1999_v26, %v4394_v14 }
 0x398   :  { %v2310_v50 = vadd.f32 %v4466_v23, %v2249_v25  ;;  %v4615_v25 = vpop.permute.xlu1 %2446  ;;  %v2086_v4 = vadd.f32 %v2085_v5, %v1997_v31 }
 0x39a   :  { %v2342_v35 = vmax.f32 %v2310_v50, 0.0  ;;  %v2088_v6 = vpop.f32.mrf.mxu1 }
 0x39b   :  { %v2162_v42 = vpop.f32.mrf.mxu2  ;;  %v2251_v27 = vpop.f32.mrf.mxu3 }
 0x39c   :  { %v2163_v46 = vadd.f32 %v2162_v42, %v2074_v44  ;;  %2374 = vxpose.xlu2.b32.end [16/16] %v2342_v35, 128 }
 0x39e   :  { %v2252_v13 = vadd.f32 %v2251_v27, %v2163_v46  ;;  %v2001_v1 = vpop.f32.mrf.mxu0 }
 0x39f   :  { %v2002_v14 = vadd.f32 %v2001_v1, %v4406_v29 }
 0x3a0   :  { %v2311_v63 = vadd.f32 %v4466_v23, %v2252_v13  ;;  %v4622_v56 = vpop.permute.xlu1 %2451 }
 0x3a2   :  { %v2343_v52 = vmax.f32 %v2311_v63, 0.0  ;;  %v2090_v49 = vpop.f32.mrf.mxu1 }
 0x3a3   :  { %v2164_v51 = vpop.f32.mrf.mxu2  ;;  %v2253_v62 = vpop.f32.mrf.mxu3  ;;  %v2091_v5 = vadd.f32 %v2090_v49, %v2002_v14 }
 0x3a4   :  { %v2165_v37 = vadd.f32 %v2164_v51, %v2076_v8  ;;  %2391 = vxpose.xlu0.b32.start [1/16] %v2343_v52, 128  ;;  %v2089_v51 = vadd.f32 %v2088_v6, %v2000_v10 }
 0x3a6   :  { %v2254_v33 = vadd.f32 %v2253_v62, %v2165_v37  ;;  %v2004_v27 = vpop.f32.mrf.mxu0 }
 0x3a8   :  { %v2312_v19 = vadd.f32 %v4466_v23, %v2254_v33 }
 0x3aa   :  { %v2344_v9 = vmax.f32 %v2312_v19, 0.0  ;;  %v2093_v62 = vpop.f32.mrf.mxu1 }
 0x3ab   :  { %v2167_v53 = vpop.f32.mrf.mxu2  ;;  %v2256_v57 = vpop.f32.mrf.mxu3 }
 0x3ac   :  { %v2168_v59 = vadd.f32 %v2167_v53, %v2079_v11  ;;  %2392 = vxpose.xlu0.b32.cont [2/16] %v2344_v9, 128 }
 0x3ae   :  { %v2257_v32 = vadd.f32 %v2256_v57, %v2168_v59  ;;  %v2006_v53 = vpop.f32.mrf.mxu0 }
 0x3b0   :  { %v2313_v43 = vadd.f32 %v4466_v23, %v2257_v32  ;;  %v4627_v32 = vpop.permute.xlu1 %2456 }
 0x3b2   :  { %v2345_v22 = vmax.f32 %v2313_v43, 0.0 }
 0x3b3   :  { %v2169_v58 = vpop.f32.mrf.mxu2  ;;  %v2258_v30 = vpop.f32.mrf.mxu3 }
 0x3b4   :  { %v2170_v34 = vadd.f32 %v2169_v58, %v2081_v28  ;;  %2393 = vxpose.xlu0.b32.cont [3/16] %v2345_v22, 128  ;;  %v2095_v22 = vpop.f32.mrf.mxu1 }
 0x3b6   :  { %v2259_v38 = vadd.f32 %v2258_v30, %v2170_v34  ;;  %v2005_v34 = vadd.f32 %v2004_v27, %v4408_v12  ;;  %v2009_v6 = vpop.f32.mrf.mxu0 }
 0x3b8   :  { %v2314_v36 = vadd.f32 %v4466_v23, %v2259_v38 }
 0x3ba   :  { %v2346_v3 = vmax.f32 %v2314_v36, 0.0  ;;  %v2094_v36 = vadd.f32 %v2093_v62, %v2005_v34 }
 0x3bb   :  { %v2172_v61 = vpop.f32.mrf.mxu2  ;;  %v2261_v60 = vpop.f32.mrf.mxu3 }
 0x3bc   :  { %v2173_v15 = vadd.f32 %v2172_v61, %v2084_v7  ;;  %2394 = vxpose.xlu0.b32.cont [4/16] %v2346_v3, 128 }
 0x3bd   :  { %v2375_v17 = vpop.trf.xlu2 }
 0x3be   :  { %v2262_v39 = vadd.f32 %v2261_v60, %v2173_v15  ;;  %v2519_v13 = vmul.f32 %v4610_v45, %v2375_v17  ;;  %v4632_v15 = vpop.permute.xlu1 %2461  ;;  %v2007_v17 = vadd.f32 %v2006_v53, %v4420_v54 }
 0x3c0   :  { %v2315_v50 = vadd.f32 %v4466_v23, %v2262_v39  ;;  %v2098_v39 = vpop.f32.mrf.mxu1 }
 0x3c2   :  { %v2347_v44 = vmax.f32 %v2315_v50, 0.0 }
 0x3c3   :  { %v2174_v35 = vpop.f32.mrf.mxu2  ;;  %v2263_v46 = vpop.f32.mrf.mxu3 }
 0x3c4   :  { %v2175_v42 = vadd.f32 %v2174_v35, %v2086_v4  ;;  %2395 = vxpose.xlu0.b32.cont [5/16] %v2347_v44, 128  ;;  %v2096_v4 = vadd.f32 %v2095_v22, %v2007_v17  ;;  %v2011_v35 = vpop.f32.mrf.mxu0 }
 0x3c5   :  { %v2376_v21 = vpop.trf.xlu2  ;;  %v2012_v62 = vadd.f32 %v2011_v35, %v4434_v18 }
 0x3c6   :  { %v2264_v63 = vadd.f32 %v2263_v46, %v2175_v42  ;;  %v2521_v20 = vmul.f32 %v4615_v25, %v2376_v21  ;;  %v2010_v21 = vadd.f32 %v2009_v6, %v4422_v0 }
 0x3c8   :  { %v2316_v8 = vadd.f32 %v4466_v23, %v2264_v63  ;;  %v2551_v52 = vadd.f32 %v2521_v20, %v2519_v13  ;;  %v2100_v13 = vpop.f32.mrf.mxu1  ;;  %v2099_v63 = vadd.f32 %v2098_v39, %v2010_v21 }
 0x3ca   :  { %v2348_v37 = vmax.f32 %v2316_v8, 0.0 }
 0x3cb   :  { %v2177_v48 = vpop.f32.mrf.mxu2  ;;  %v2266_v16 = vpop.f32.mrf.mxu3 }
 0x3cc   :  { %v2178_v33 = vadd.f32 %v2177_v48, %v2089_v51  ;;  %2396 = vxpose.xlu0.b32.cont [6/16] %v2348_v37, 128  ;;  %v2014_v37 = vpop.f32.mrf.mxu0 }
 0x3cd   :  { %v2377_v19 = vpop.trf.xlu2  ;;  %v2015_v53 = vadd.f32 %v2014_v37, %v4436_v47 }
 0x3ce   :  { %v2267_v11 = vadd.f32 %v2266_v16, %v2178_v33  ;;  %v2523_v9 = vmul.f32 %v4622_v56, %v2377_v19  ;;  %v2101_v16 = vadd.f32 %v2100_v13, %v2012_v62 }
 0x3d0   :  { %v2317_v59 = vadd.f32 %v4466_v23, %v2267_v11  ;;  %v2552_v57 = vadd.f32 %v2551_v52, %v2523_v9  ;;  %v2103_v14 = vpop.f32.mrf.mxu1 }
 0x3d2   :  { %v2349_v40 = vmax.f32 %v2317_v59, 0.0 }
 0x3d3   :  { %v2179_v43 = vpop.f32.mrf.mxu2  ;;  %v2268_v28 = vpop.f32.mrf.mxu3 }
 0x3d4   :  { %v2180_v26 = vadd.f32 %v2179_v43, %v2091_v5  ;;  %2397 = vxpose.xlu0.b32.cont [7/16] %v2349_v40, 128  ;;  %v2104_v40 = vadd.f32 %v2103_v14, %v2015_v53 }
 0x3d5   :  { %v2378_v58 = vpop.trf.xlu2 }
 0x3d6   :  { %v2269_v29 = vadd.f32 %v2268_v28, %v2180_v26  ;;  %v2525_v30 = vmul.f32 %v4627_v32, %v2378_v58 }
 0x3d8   :  { %v2318_v2 = vadd.f32 %v4466_v23, %v2269_v29  ;;  %v2553_v38 = vadd.f32 %v2552_v57, %v2525_v30  ;;  %v2016_v57 = vpop.f32.mrf.mxu0  ;;  %v2105_v22 = vpop.f32.mrf.mxu1 }
 0x3d9   :  { %v2017_v58 = vadd.f32 %v2016_v57, %v4448_v24 }
 0x3da   :  { %v2350_v7 = vmax.f32 %v2318_v2, 0.0 }
 0x3db   :  { %v2182_v3 = vpop.f32.mrf.mxu2  ;;  %v2271_v61 = vpop.f32.mrf.mxu3  ;;  %v2106_v2 = vadd.f32 %v2105_v22, %v2017_v58 }
 0x3dc   :  { %v2183_v1 = vadd.f32 %v2182_v3, %v2094_v36  ;;  %2398 = vxpose.xlu0.b32.cont [8/16] %v2350_v7, 128 }
 0x3dd   :  { %v2379_v60 = vpop.trf.xlu2 }
 0x3de   :  { %v2272_v31 = vadd.f32 %v2271_v61, %v2183_v1  ;;  %v2527_v12 = vmul.f32 %v4632_v15, %v2379_v60 }
 0x3e0   :  { %v2319_v50 = vadd.f32 %v4466_v23, %v2272_v31  ;;  %v4637_v49 = vadd.f32 %v2553_v38, %v2527_v12  ;;  %v2019_v30 = vpop.f32.mrf.mxu0  ;;  %v2108_v1 = vpop.f32.mrf.mxu1 }
 0x3e1   :  { %v2020_v7 = vadd.f32 %v2019_v30, %v4450_v41 }
 0x3e2   :  { %v2351_v44 = vmax.f32 %v2319_v50, 0.0 }
 0x3e3   :  { %v2184_v42 = vpop.f32.mrf.mxu2  ;;  %v2273_v27 = vpop.f32.mrf.mxu3  ;;  %v2109_v60 = vadd.f32 %v2108_v1, %v2020_v7 }
 0x3e4   :  { %v2185_v46 = vadd.f32 %v2184_v42, %v2096_v4  ;;  %2399 = vxpose.xlu0.b32.cont [9/16] %v2351_v44, 128 }
 0x3e6   :  { %v2274_v10 = vadd.f32 %v2273_v27, %v2185_v46 }
 0x3e8   :  { %v2320_v54 = vadd.f32 %v4466_v23, %v2274_v10  ;;  %v2021_v31 = vpop.f32.mrf.mxu0  ;;  %v2110_v35 = vpop.f32.mrf.mxu1 }
 0x3e9   :  { %v2022_v50 = vadd.f32 %v2021_v31, %v4460_v55 }
 0x3ea   :  { %v2352_v20 = vmax.f32 %v2320_v54, 0.0 }
 0x3eb   :  { %v2187_v8 = vpop.f32.mrf.mxu2  ;;  %v2276_v51 = vpop.f32.mrf.mxu3  ;;  %v2111_v42 = vadd.f32 %v2110_v35, %v2022_v50 }
 0x3ec   :  { %v2188_v52 = vadd.f32 %v2187_v8, %v2099_v63  ;;  %2400 = vxpose.xlu0.b32.cont [10/16] %v2352_v20, 128  ;;  %v2380_v20 = vpop.trf.xlu2  ;;  %v2467_v8 = vpop.permute.xlu1 %2466 }
 0x3ee   :  { %v2277_v48 = vadd.f32 %v2276_v51, %v2188_v52 }
 0x3f0   :  { %v2321_v33 = vadd.f32 %v4466_v23, %v2277_v48 }
 0x3f2   :  { %v2353_v19 = vmax.f32 %v2321_v33, 0.0 }
 0x3f3   :  { %v2189_v0 = vpop.f32.mrf.mxu2  ;;  %v2278_v9 = vpop.f32.mrf.mxu3 }
 0x3f4   :  { %v2190_v11 = vadd.f32 %v2189_v0, %v2101_v16  ;;  %2401 = vxpose.xlu0.b32.cont [11/16] %v2353_v19, 128  ;;  %v2381_v62 = vpop.trf.xlu2  ;;  %v2472_v48 = vpop.permute.xlu1 %2471 }
 0x3f6   :  { %v2279_v59 = vadd.f32 %v2278_v9, %v2190_v11 }
 0x3f8   :  { %v2322_v5 = vadd.f32 %v4466_v23, %v2279_v59 }
 0x3fa   :  { %v2354_v43 = vmax.f32 %v2322_v5, 0.0 }
 0x3fb   :  { %v2192_v26 = vpop.f32.mrf.mxu2  ;;  %v2281_v28 = vpop.f32.mrf.mxu3 }
 0x3fc   :  { %v2193_v18 = vadd.f32 %v2192_v26, %v2104_v40  ;;  %2402 = vxpose.xlu0.b32.cont [12/16] %v2354_v43, 128  ;;  %v2382_v14 = vpop.trf.xlu2  ;;  %v2477_v11 = vpop.permute.xlu1 %2476 }
 0x3fe   :  { %v2282_v34 = vadd.f32 %v2281_v28, %v2193_v18 }
 0x400   :  { %v2323_v29 = vadd.f32 %v4466_v23, %v2282_v34 }
 0x402   :  { %v2355_v38 = vmax.f32 %v2323_v29, 0.0 }
 0x403   :  { %v2194_v47 = vpop.f32.mrf.mxu2  ;;  %v2283_v36 = vpop.f32.mrf.mxu3 }
 0x404   :  { %v2195_v6 = vadd.f32 %v2194_v47, %v2106_v2  ;;  %2403 = vxpose.xlu0.b32.cont [13/16] %v2355_v38, 128  ;;  %v2383_v57 = vpop.trf.xlu2  ;;  %v2482_v5 = vpop.permute.xlu1 %2481 }
 0x406   :  { %v2284_v3 = vadd.f32 %v2283_v36, %v2195_v6  ;;  %v2531_v36 = vmul.f32 %v2472_v48, %v2381_v62 }
 0x408   :  { %v2324_v61 = vadd.f32 %v4466_v23, %v2284_v3  ;;  %v2533_v3 = vmul.f32 %v2477_v11, %v2382_v14 }
 0x40a   :  { %v2356_v17 = vmax.f32 %v2324_v61, 0.0  ;;  %v2535_v61 = vmul.f32 %v2482_v5, %v2383_v57 }
 0x40b   :  { %v2197_v24 = vpop.f32.mrf.mxu2  ;;  %v2286_v39 = vpop.f32.mrf.mxu3 }
 0x40c   :  { %v2198_v12 = vadd.f32 %v2197_v24, %v2109_v60  ;;  %2404 = vxpose.xlu0.b32.cont [14/16] %v2356_v17, 128  ;;  %v2384_v40 = vpop.trf.xlu2  ;;  %v2487_v43 = vpop.permute.xlu1 %2486 }
 0x40d   :  { %v2537_v31 = vmul.f32 %v2487_v43, %v2384_v40 }
 0x40e   :  { %v2287_v4 = vadd.f32 %v2286_v39, %v2198_v12 }
 0x410   :  { %v2325_v44 = vadd.f32 %v4466_v23, %v2287_v4 }
 0x412   :  { %v2357_v46 = vmax.f32 %v2325_v44, 0.0 }
 0x413   :  { %v2199_v41 = vpop.f32.mrf.mxu2  ;;  %v2288_v21 = vpop.f32.mrf.mxu3 }
 0x414   :  { %v2200_v27 = vadd.f32 %v2199_v41, %v2111_v42  ;;  %2405 = vxpose.xlu0.b32.cont [15/16] %v2357_v46, 128  ;;  %v2385_v18 = vpop.trf.xlu2  ;;  %v2492_v28 = vpop.permute.xlu1 %2491 }
 0x415   :  { %v2539_v50 = vmul.f32 %v2492_v28, %v2385_v18 }
 0x416   :  { %v2289_v10 = vadd.f32 %v2288_v21, %v2200_v27 }
 0x418   :  { %v2326_v54 = vadd.f32 %v4466_v23, %v2289_v10 }
 0x41a   :  { %v2358_v13 = vmax.f32 %v2326_v54, 0.0 }
 0x41c   :  { %2406 = vxpose.xlu0.b32.end [16/16] %v2358_v13, 128  ;;  %v2386_v22 = vpop.trf.xlu2  ;;  %v2497_v34 = vpop.permute.xlu1 %2496 }
 0x41d   :  { %v2541_v44 = vmul.f32 %v2497_v34, %v2386_v22 }
 0x424   :  { %v2502_v30 = vpop.permute.xlu1 %2501 }
 0x42c   :  { %v2507_v47 = vpop.permute.xlu1 %2506 }
 0x434   :  { %v2512_v24 = vpop.permute.xlu1 %2511 }
 0x448   :  { %v2407_v63 = vpop.trf.xlu0 }
 0x449   :  { %v2520_v55 = vmul.f32 %v4610_v45, %v2407_v63 }
 0x450   :  { %v2408_v52 = vpop.trf.xlu0 }
 0x451   :  { %v2522_v51 = vmul.f32 %v4615_v25, %v2408_v52 }
 0x453   :  { %v2572_v37 = vadd.f32 %v2522_v51, %v2520_v55  ;;  %v2517_v51 = vpop.permute.xlu1 %2516 }
 0x458   :  { %v2409_v33 = vpop.trf.xlu0 }
 0x459   :  { %v2524_v16 = vmul.f32 %v4622_v56, %v2409_v33 }
 0x45b   :  { %v2573_v19 = vadd.f32 %v2572_v37, %v2524_v16 }
 0x460   :  { %v2410_v0 = vpop.trf.xlu0 }
 0x461   :  { %v2526_v23 = vmul.f32 %v4627_v32, %v2410_v0  ;;  %v2387_v32 = vpop.trf.xlu2 }
 0x462   :  { %v2543_v46 = vmul.f32 %v2502_v30, %v2387_v32 }
 0x463   :  { %v2574_v9 = vadd.f32 %v2573_v19, %v2526_v23 }
 0x468   :  { %v2411_v53 = vpop.trf.xlu0 }
 0x469   :  { %v2528_v59 = vmul.f32 %v4632_v15, %v2411_v53  ;;  %v2388_v38 = vpop.trf.xlu2  ;;  %v2529_v15 = vmul.f32 %v2467_v8, %v2380_v20 }
 0x46a   :  { %v2545_v21 = vmul.f32 %v2507_v47, %v2388_v38 }
 0x46b   :  { %v2575_v45 = vadd.f32 %v2574_v9, %v2528_v59  ;;  %v2555_v7 = vadd.f32 %v4637_v49, %v2529_v15 }
 0x46d   :  { %v2556_v1 = vadd.f32 %v2555_v7, %v2531_v36 }
 0x46f   :  { %v2557_v17 = vadd.f32 %v2556_v1, %v2533_v3  ;;  %v4759_v3 = vlaneseq }
 0x470   :  { %v2412_v25 = vpop.trf.xlu0 }
 0x471   :  { %v2389_v60 = vpop.trf.xlu2  ;;  %v2558_v39 = vadd.f32 %v2557_v17, %v2535_v61  ;;  %v2530_v35 = vmul.f32 %v2467_v8, %v2412_v25  ;;  %vm2605_vm3 = vcmp.lt.s32.totalorder %v4759_v3, 256 }
 0x472   :  { %v2547_v20 = vmul.f32 %v2512_v24, %v2389_v60 }
 0x473   :  { %v2559_v4 = vadd.f32 %v2558_v39, %v2537_v31  ;;  %v2576_v10 = vadd.f32 %v2575_v45, %v2530_v35 }
 0x475   :  { %v2560_v42 = vadd.f32 %v2559_v4, %v2539_v50 }
 0x477   :  { %v2561_v27 = vadd.f32 %v2560_v42, %v2541_v44 }
 0x478   :  { %v2413_v26 = vpop.trf.xlu0 }
 0x479   :  { %v2532_v41 = vmul.f32 %v2472_v48, %v2413_v26  ;;  %v2390_v54 = vpop.trf.xlu2  ;;  %v2562_v63 = vadd.f32 %v2561_v27, %v2543_v46 }
 0x47a   :  { %v2549_v62 = vmul.f32 %v2517_v51, %v2390_v54 }
 0x47b   :  { %v2577_v52 = vadd.f32 %v2576_v10, %v2532_v41  ;;  %v2563_v37 = vadd.f32 %v2562_v63, %v2545_v21 }
 0x47d   :  { %v2564_v19 = vadd.f32 %v2563_v37, %v2547_v20 }
 0x47f   :  { %v2565_v0 = vadd.f32 %v2564_v19, %v2549_v62 }
 0x480   :  { %v2414_v56 = vpop.trf.xlu0 }
 0x481   :  { %v2534_v49 = vmul.f32 %v2477_v11, %v2414_v56  ;;  %v2566_v59 = vrot.slane %v2565_v0, 4 }
 0x483   :  { %v2578_v33 = vadd.f32 %v2577_v52, %v2534_v49 }
 0x488   :  { %v2415_v58 = vpop.trf.xlu0 }
 0x489   :  { %v2536_v55 = vmul.f32 %v2482_v5, %v2415_v58  ;;  %v2567_v5 = vadd.f32 %v2566_v59, %v2565_v0 }
 0x48b   :  { %v2579_v8 = vadd.f32 %v2578_v33, %v2536_v55 }
 0x490   :  { %v2416_v29 = vpop.trf.xlu0 }
 0x491   :  { %v2538_v16 = vmul.f32 %v2487_v43, %v2416_v29  ;;  %v2568_v43 = vrot.slane %v2567_v5, 2 }
 0x493   :  { %v2580_v48 = vadd.f32 %v2579_v8, %v2538_v16 }
 0x498   :  { %v2417_v2 = vpop.trf.xlu0 }
 0x499   :  { %v2540_v14 = vmul.f32 %v2492_v28, %v2417_v2  ;;  %v2569_v28 = vadd.f32 %v2568_v43, %v2567_v5 }
 0x49b   :  { %v2581_v53 = vadd.f32 %v2580_v48, %v2540_v14 }
 0x4a0   :  { %v2418_v6 = vpop.trf.xlu0 }
 0x4a1   :  { %v2542_v23 = vmul.f32 %v2497_v34, %v2418_v6  ;;  %v2570_v34 = vrot.slane %v2569_v28, 1 }
 0x4a3   :  { %v2582_v57 = vadd.f32 %v2581_v53, %v2542_v23 }
 0x4a8   :  { %v2419_v12 = vpop.trf.xlu0 }
 0x4a9   :  { %v2544_v11 = vmul.f32 %v2502_v30, %v2419_v12  ;;  %v2571_v30 = vadd.f32 %v2570_v34, %v2569_v28 }
 0x4ab   :  { %v2583_v25 = vadd.f32 %v2582_v57, %v2544_v11 }
 0x4b0   :  { %v2420_v13 = vpop.trf.xlu0 }
 0x4b1   :  { %v2546_v45 = vmul.f32 %v2507_v47, %v2420_v13  ;;  %v2594_v47 = vstv %s4673_s8 }
 0x4b2   :  { %v2595_v7 = vadd.f32 %v2594_v47, %v2571_v30 }
 0x4b3   :  { %v2584_v26 = vadd.f32 %v2583_v25, %v2546_v45 }
 0x4b8   :  { %v2421_v9 = vpop.trf.xlu0 }
 0x4b9   :  { %v2548_v40 = vmul.f32 %v2512_v24, %v2421_v9 }
 0x4bb   :  { %v2585_v56 = vadd.f32 %v2584_v26, %v2548_v40 }
 0x4c0   :  { %v2422_v18 = vpop.trf.xlu0 }
 0x4c1   :  { %v2550_v22 = vmul.f32 %v2517_v51, %v2422_v18 }
 0x4c3   :  { %v2586_v58 = vadd.f32 %v2585_v56, %v2550_v22 }
 0x4c5   :  { %v2587_v29 = vrot.slane %v2586_v58, 4 }
 0x4c7   :  { %v2588_v32 = vadd.f32 %v2587_v29, %v2586_v58 }
 0x4c9   :  { %v2589_v2 = vrot.slane %v2588_v32, 2 }
 0x4cb   :  { %v2590_v38 = vadd.f32 %v2589_v2, %v2588_v32 }
 0x4cd   :  { %v2591_v15 = vrot.slane %v2590_v38, 1 }
 0x4cf   :  { %v2592_v6 = vadd.f32 %v2591_v15, %v2590_v38 }
 0x4d1   :  { %v2596_v36 = vadd.f32 %v2594_v47, %v2592_v6 }
 0x4d3   :  { %v2599_v1 = vrot.slane %v2596_v36, 7 }
 0x4d5   :  { %v2601_v61 = vsel %vm2600_vm2, %v2595_v7, %v2599_v1 }
 0x4d6   :  { %2607 = vst.msk [vmem:[%s4674_s9] sm:$0x3] %vm2605_vm3, %v2601_v61 }

</bundles_post_ra>
